<compile_context>
chip_gen: v6e
topology: v6e:2x2x1
jax: 0.10.0
libtpu: 0.0.40
codegen_flags: <defaults>
</compile_context>

<pallas_src>
import functools

import jax
import jax.numpy as jnp
from jax.experimental import pallas as pl
from jax.experimental.pallas import tpu as pltpu

EPS = 1e-5
LANE = 128


def _round_up(x, m):
    return ((x + m - 1) // m) * m


def _conv_stats_kernel(add_residual, H, W, xp_ref, w_ref, conv_ref, sum_ref, ssq_ref):
    """One batch element per grid step.

    xp_ref  : (1, H+2, W+2, Cin_p)  halo- and channel-padded input (VMEM)
    w_ref   : (9*Cin_p, Cout_p)     im2col-ordered conv weight
    conv_ref: (1, H, W, Cout_p)     conv(+residual) activations for this image
    sum_ref : (1, 1, Cout_p)        per-image per-channel sum
    ssq_ref : (1, 1, Cout_p)        per-image per-channel sum of squares
    """
    Cin_p = xp_ref.shape[-1]
    Cout_p = conv_ref.shape[-1]

    # im2col: 9 shifted HxW windows concatenated along the (lane) channel axis.
    cols = []
    for dy in range(3):
        for dx in range(3):
            cols.append(
                xp_ref[0, dy:dy + H, dx:dx + W, :]
                .astype(jnp.float32)
                .reshape(H * W, Cin_p))
    patch = jnp.concatenate(cols, axis=-1)                       # (H*W, 9*Cin_p)

    # Single MXU matmul, K = 9*Cin_p, f32 accumulation.
    acc = jnp.dot(patch.astype(w_ref.dtype), w_ref[...],
                  preferred_element_type=jnp.float32)            # (H*W, Cout_p)

    if add_residual:                      # in_channels == out_channels -> Cin_p == Cout_p
        acc = acc + cols[4]               # centre tap (dy=1, dx=1) == the input itself

    conv_ref[...] = acc.reshape(1, H, W, Cout_p)

    # Fused BN partial statistics (biased training-mode stats, combined in pass 2).
    sum_ref[...] = jnp.sum(acc, axis=0, keepdims=True).reshape(1, 1, Cout_p)
    ssq_ref[...] = jnp.sum(acc * acc, axis=0, keepdims=True).reshape(1, 1, Cout_p)


def _bn_relu_kernel(inv_count, sum_ref, ssq_ref, gamma_ref, beta_ref, conv_ref, out_ref):
    """BatchNorm2d (training statistics, eps=1e-5) + affine + ReLU for one image.

    sum_ref / ssq_ref : (N, 1, Cout_p) per-image partial stats (same block every step)
    gamma_ref/beta_ref: (1, Cout_p)
    conv_ref / out_ref: (1, H, W, Cout_p)
    """
    mean = jnp.sum(sum_ref[...], axis=0) * inv_count             # (1, Cout_p)
    ex2 = jnp.sum(ssq_ref[...], axis=0) * inv_count              # (1, Cout_p)
    var = jnp.maximum(ex2 - mean * mean, 0.0)                    # biased variance
    scale = gamma_ref[...] * jax.lax.rsqrt(var + EPS)            # (1, Cout_p)
    shift = beta_ref[...] - mean * scale
    y = conv_ref[...] * scale + shift                            # broadcast over (H, W)
    out_ref[...] = jnp.maximum(y, 0.0).astype(out_ref.dtype)


def basic_block_light(x_nchw, w_oihw, gamma, beta, *, mxu_dtype=jnp.float32):
    """Forward pass of BasicBlock_light.

    x_nchw: (N, Cin, H, W); w_oihw: (Cout, Cin, 3, 3); gamma/beta: (Cout,).
    mxu_dtype: set to jnp.bfloat16 on v6e/v7x for the fast MXU path once the conv
    is MXU-bound (loosen numerical tolerances accordingly).
    """
    N, Cin, H, W = x_nchw.shape
    Cout = w_oihw.shape[0]
    add_residual = (Cin == Cout)

    Cin_p = _round_up(Cin, LANE)
    Cout_p = _round_up(Cout, LANE)

    # --- glue: NCHW -> NHWC, channels -> lane width, halo padding ------------------
    x = jnp.transpose(x_nchw, (0, 2, 3, 1))                                  # (N,H,W,Cin)
    xp = jnp.pad(x, ((0, 0), (1, 1), (1, 1), (0, Cin_p - Cin)))              # (N,H+2,W+2,Cin_p)

    w = jnp.transpose(w_oihw, (2, 3, 1, 0))                                  # (3,3,Cin,Cout)
    w = jnp.pad(w, ((0, 0), (0, 0), (0, Cin_p - Cin), (0, Cout_p - Cout)))
    w_mat = w.reshape(9 * Cin_p, Cout_p).astype(mxu_dtype)                   # im2col weight

    gamma_p = jnp.pad(gamma.astype(jnp.float32), (0, Cout_p - Cout)).reshape(1, Cout_p)
    beta_p = jnp.pad(beta.astype(jnp.float32), (0, Cout_p - Cout)).reshape(1, Cout_p)

    vmem_limit = 48 * 1024 * 1024       # headroom inside v7x's 64 MiB physical VMEM
    w_bytes = 9 * Cin_p * Cout_p * jnp.dtype(mxu_dtype).itemsize

    # --- pass 1: conv3x3 (+residual) and per-image BN partial statistics -----------
    conv_flops = 2 * N * H * W * (9 * Cin_p) * Cout_p
    conv_bytes = (4 * N * (H + 2) * (W + 2) * Cin_p + w_bytes
                  + 4 * N * H * W * Cout_p + 8 * N * Cout_p)
    conv, psum, pssq = pl.pallas_call(
        functools.partial(_conv_stats_kernel, add_residual, H, W),
        grid=(N,),
        in_specs=[
            pl.BlockSpec((1, H + 2, W + 2, Cin_p), lambda n: (n, 0, 0, 0)),
            pl.BlockSpec((9 * Cin_p, Cout_p), lambda n: (0, 0)),
        ],
        out_specs=(
            pl.BlockSpec((1, H, W, Cout_p), lambda n: (n, 0, 0, 0)),
            pl.BlockSpec((1, 1, Cout_p), lambda n: (n, 0, 0)),
            pl.BlockSpec((1, 1, Cout_p), lambda n: (n, 0, 0)),
        ),
        out_shape=(
            jax.ShapeDtypeStruct((N, H, W, Cout_p), jnp.float32),
            jax.ShapeDtypeStruct((N, 1, Cout_p), jnp.float32),
            jax.ShapeDtypeStruct((N, 1, Cout_p), jnp.float32),
        ),
        compiler_params=pltpu.CompilerParams(
            dimension_semantics=("parallel",),       # batch tiles split across TCs (v7x)
            vmem_limit_bytes=vmem_limit),
        cost_estimate=pl.CostEstimate(
            flops=conv_flops, transcendentals=0, bytes_accessed=conv_bytes),
    )(xp, w_mat)

    # --- pass 2: BatchNorm (training stats) + affine + ReLU, lane-dense stores -----
    inv_count = 1.0 / float(N * H * W)
    bn_bytes = 4 * (2 * N * H * W * Cout_p + 2 * N * Cout_p + 2 * Cout_p)
    out_p = pl.pallas_call(
        functools.partial(_bn_relu_kernel, inv_count),
        grid=(N,),
        in_specs=[
            pl.BlockSpec((N, 1, Cout_p), lambda n: (0, 0, 0)),
            pl.BlockSpec((N, 1, Cout_p), lambda n: (0, 0, 0)),
            pl.BlockSpec((1, Cout_p), lambda n: (0, 0)),
            pl.BlockSpec((1, Cout_p), lambda n: (0, 0)),
            pl.BlockSpec((1, H, W, Cout_p), lambda n: (n, 0, 0, 0)),
        ],
        out_specs=pl.BlockSpec((1, H, W, Cout_p), lambda n: (n, 0, 0, 0)),
        out_shape=jax.ShapeDtypeStruct((N, H, W, Cout_p), x_nchw.dtype),
        compiler_params=pltpu.CompilerParams(
            dimension_semantics=("parallel",),
            vmem_limit_bytes=vmem_limit),
        cost_estimate=pl.CostEstimate(
            flops=4 * N * H * W * Cout_p, transcendentals=N * Cout_p,
            bytes_accessed=bn_bytes),
    )(psum, pssq, gamma_p, beta_p, conv)

    # --- glue: drop channel padding, back to NCHW -----------------------------------
    return jnp.transpose(out_p[..., :Cout], (0, 3, 1, 2))


def _reference(x_nchw, w_oihw, gamma, beta):
    """Pure-JAX reference matching the PyTorch forward (training-mode BN)."""
    Cin = x_nchw.shape[1]
    Cout = w_oihw.shape[0]
    y = jax.lax.conv_general_dilated(
        x_nchw, w_oihw, window_strides=(1, 1), padding=((1, 1), (1, 1)),
        dimension_numbers=("NCHW", "OIHW", "NCHW"),
        precision=jax.lax.Precision.HIGHEST)
    if Cin == Cout:
        y = y + x_nchw
    mean = y.mean(axis=(0, 2, 3), keepdims=True)
    var = ((y - mean) ** 2).mean(axis=(0, 2, 3), keepdims=True)
    yn = (y - mean) / jnp.sqrt(var + EPS)
    yn = yn * gamma.reshape(1, -1, 1, 1) + beta.reshape(1, -1, 1, 1)
    return jnp.maximum(yn, 0.0)


if __name__ == "__main__":
    # batch=2, in_channels=out_channels=4 (exercises the residual branch), 16x16 spatial.
    N, Cin, Cout, H, W = 2, 4, 4, 16, 16

    key = jax.random.PRNGKey(0)
    kx, kw, kg, kb = jax.random.split(key, 4)
    x = jax.random.normal(kx, (N, Cin, H, W), dtype=jnp.float32)
    w = jax.random.normal(kw, (Cout, Cin, 3, 3), dtype=jnp.float32) * 0.2
    gamma = 1.0 + 0.1 * jax.random.normal(kg, (Cout,), dtype=jnp.float32)
    beta = 0.1 * jax.random.normal(kb, (Cout,), dtype=jnp.float32)

    out = jax.block_until_ready(basic_block_light(x, w, gamma, beta))
    ref = _reference(x, w, gamma, beta)

    assert out.shape == (N, Cout, H, W)
    max_err = float(jnp.max(jnp.abs(out - ref)))
    assert jnp.allclose(out, ref, atol=1e-3, rtol=1e-3), max_err

    print("KERNEL_OK")
</pallas_src>

<mosaic_0001>
module attributes {stable_mosaic.version = 11 : i64} {
  func.func @_conv_stats_kernel(%arg0: i32, %arg1: memref<1x18x18x128xf32, #tpu.memory_space<vmem>>, %arg2: memref<1152x128xf32, #tpu.memory_space<vmem>>, %arg3: memref<1x16x16x128xf32, #tpu.memory_space<vmem>>, %arg4: memref<1x1x128xf32, #tpu.memory_space<vmem>>, %arg5: memref<1x1x128xf32, #tpu.memory_space<vmem>>) attributes {dimension_semantics = [#tpu.dimension_semantics<parallel>], iteration_bounds = array<i64: 2>, scalar_prefetch = 0 : i64, scratch_operands = 0 : i64, tpu.core_type = #tpu.core_type<tc>, window_params = [{transform_indices = @transform_0, window_bounds = array<i64: 1, 18, 18, 128>}, {pipeline_mode = #tpu.pipeline_mode<synchronous>, transform_indices = @transform_1, window_bounds = array<i64: 1152, 128>}, {transform_indices = @transform_2, window_bounds = array<i64: 1, 16, 16, 128>}, {transform_indices = @transform_3, window_bounds = array<i64: 1, 1, 128>}, {transform_indices = @transform_4, window_bounds = array<i64: 1, 1, 128>}]} {
    %c0 = arith.constant 0 : index
    %c0_0 = arith.constant 0 : index
    %c0_1 = arith.constant 0 : index
    %c0_2 = arith.constant 0 : index
    %0 = vector.load %arg1[%c0, %c0_0, %c0_1, %c0_2] : memref<1x18x18x128xf32, #tpu.memory_space<vmem>>, vector<1x16x16x128xf32>
    %1 = vector.shape_cast %0 : vector<1x16x16x128xf32> to vector<16x16x128xf32>
    %2 = vector.shape_cast %1 : vector<16x16x128xf32> to vector<256x128xf32>
    %c0_3 = arith.constant 0 : index
    %c0_4 = arith.constant 0 : index
    %c1 = arith.constant 1 : index
    %c0_5 = arith.constant 0 : index
    %3 = vector.load %arg1[%c0_3, %c0_4, %c1, %c0_5] : memref<1x18x18x128xf32, #tpu.memory_space<vmem>>, vector<1x16x16x128xf32>
    %4 = vector.shape_cast %3 : vector<1x16x16x128xf32> to vector<16x16x128xf32>
    %5 = vector.shape_cast %4 : vector<16x16x128xf32> to vector<256x128xf32>
    %c0_6 = arith.constant 0 : index
    %c0_7 = arith.constant 0 : index
    %c2 = arith.constant 2 : index
    %c0_8 = arith.constant 0 : index
    %6 = vector.load %arg1[%c0_6, %c0_7, %c2, %c0_8] : memref<1x18x18x128xf32, #tpu.memory_space<vmem>>, vector<1x16x16x128xf32>
    %7 = vector.shape_cast %6 : vector<1x16x16x128xf32> to vector<16x16x128xf32>
    %8 = vector.shape_cast %7 : vector<16x16x128xf32> to vector<256x128xf32>
    %c0_9 = arith.constant 0 : index
    %c1_10 = arith.constant 1 : index
    %c0_11 = arith.constant 0 : index
    %c0_12 = arith.constant 0 : index
    %9 = vector.load %arg1[%c0_9, %c1_10, %c0_11, %c0_12] : memref<1x18x18x128xf32, #tpu.memory_space<vmem>>, vector<1x16x16x128xf32>
    %10 = vector.shape_cast %9 : vector<1x16x16x128xf32> to vector<16x16x128xf32>
    %11 = vector.shape_cast %10 : vector<16x16x128xf32> to vector<256x128xf32>
    %c0_13 = arith.constant 0 : index
    %c1_14 = arith.constant 1 : index
    %c1_15 = arith.constant 1 : index
    %c0_16 = arith.constant 0 : index
    %12 = vector.load %arg1[%c0_13, %c1_14, %c1_15, %c0_16] : memref<1x18x18x128xf32, #tpu.memory_space<vmem>>, vector<1x16x16x128xf32>
    %13 = vector.shape_cast %12 : vector<1x16x16x128xf32> to vector<16x16x128xf32>
    %14 = vector.shape_cast %13 : vector<16x16x128xf32> to vector<256x128xf32>
    %c0_17 = arith.constant 0 : index
    %c1_18 = arith.constant 1 : index
    %c2_19 = arith.constant 2 : index
    %c0_20 = arith.constant 0 : index
    %15 = vector.load %arg1[%c0_17, %c1_18, %c2_19, %c0_20] : memref<1x18x18x128xf32, #tpu.memory_space<vmem>>, vector<1x16x16x128xf32>
    %16 = vector.shape_cast %15 : vector<1x16x16x128xf32> to vector<16x16x128xf32>
    %17 = vector.shape_cast %16 : vector<16x16x128xf32> to vector<256x128xf32>
    %c0_21 = arith.constant 0 : index
    %c2_22 = arith.constant 2 : index
    %c0_23 = arith.constant 0 : index
    %c0_24 = arith.constant 0 : index
    %18 = vector.load %arg1[%c0_21, %c2_22, %c0_23, %c0_24] : memref<1x18x18x128xf32, #tpu.memory_space<vmem>>, vector<1x16x16x128xf32>
    %19 = vector.shape_cast %18 : vector<1x16x16x128xf32> to vector<16x16x128xf32>
    %20 = vector.shape_cast %19 : vector<16x16x128xf32> to vector<256x128xf32>
    %c0_25 = arith.constant 0 : index
    %c2_26 = arith.constant 2 : index
    %c1_27 = arith.constant 1 : index
    %c0_28 = arith.constant 0 : index
    %21 = vector.load %arg1[%c0_25, %c2_26, %c1_27, %c0_28] : memref<1x18x18x128xf32, #tpu.memory_space<vmem>>, vector<1x16x16x128xf32>
    %22 = vector.shape_cast %21 : vector<1x16x16x128xf32> to vector<16x16x128xf32>
    %23 = vector.shape_cast %22 : vector<16x16x128xf32> to vector<256x128xf32>
    %c0_29 = arith.constant 0 : index
    %c2_30 = arith.constant 2 : index
    %c2_31 = arith.constant 2 : index
    %c0_32 = arith.constant 0 : index
    %24 = vector.load %arg1[%c0_29, %c2_30, %c2_31, %c0_32] : memref<1x18x18x128xf32, #tpu.memory_space<vmem>>, vector<1x16x16x128xf32>
    %25 = vector.shape_cast %24 : vector<1x16x16x128xf32> to vector<16x16x128xf32>
    %26 = vector.shape_cast %25 : vector<16x16x128xf32> to vector<256x128xf32>
    %27 = tpu.concatenate %2, %5, %8, %11, %14, %17, %20, %23, %26 in 1 : vector<256x128xf32>, vector<256x128xf32>, vector<256x128xf32>, vector<256x128xf32>, vector<256x128xf32>, vector<256x128xf32>, vector<256x128xf32>, vector<256x128xf32>, vector<256x128xf32> -> vector<256x1152xf32>
    %c0_33 = arith.constant 0 : index
    %c0_34 = arith.constant 0 : index
    %28 = vector.load %arg2[%c0_33, %c0_34] : memref<1152x128xf32, #tpu.memory_space<vmem>>, vector<1152x128xf32>
    %cst = arith.constant dense<0.000000e+00> : vector<256x128xf32>
    %29 = tpu.matmul %27, %28, %cst {dimension_numbers = #tpu.dot_dimension_numbers<[1], [0], [0], [1], [0, 0, 1, 1], [], []>} : vector<256x1152xf32>, vector<1152x128xf32>, vector<256x128xf32> -> vector<256x128xf32>
    %30 = arith.addf %29, %14 : vector<256x128xf32>
    %31 = vector.shape_cast %30 : vector<256x128xf32> to vector<1x16x16x128xf32>
    %c0_35 = arith.constant 0 : index
    %c0_36 = arith.constant 0 : index
    %c0_37 = arith.constant 0 : index
    %c0_38 = arith.constant 0 : index
    %32 = vector.load %arg3[%c0_35, %c0_36, %c0_37, %c0_38] : memref<1x16x16x128xf32, #tpu.memory_space<vmem>>, vector<1x16x16x128xf32>
    tpu.vector_store %arg3[%c0_35, %c0_36, %c0_37, %c0_38], %31 {strides = array<i32>} : memref<1x16x16x128xf32, #tpu.memory_space<vmem>>, vector<1x16x16x128xf32>,
    %cst_39 = arith.constant dense<0.000000e+00> : vector<128xf32>
    %33 = vector.multi_reduction <add>, %30, %cst_39 [0] : vector<256x128xf32> to vector<128xf32>
    %34 = vector.shape_cast %33 : vector<128xf32> to vector<1x128xf32>
    %35 = vector.shape_cast %34 : vector<1x128xf32> to vector<1x1x128xf32>
    %c0_40 = arith.constant 0 : index
    %c0_41 = arith.constant 0 : index
    %c0_42 = arith.constant 0 : index
    %36 = vector.load %arg4[%c0_40, %c0_41, %c0_42] : memref<1x1x128xf32, #tpu.memory_space<vmem>>, vector<1x1x128xf32>
    tpu.vector_store %arg4[%c0_40, %c0_41, %c0_42], %35 {strides = array<i32>} : memref<1x1x128xf32, #tpu.memory_space<vmem>>, vector<1x1x128xf32>,
    %37 = arith.mulf %30, %30 : vector<256x128xf32>
    %cst_43 = arith.constant dense<0.000000e+00> : vector<128xf32>
    %38 = vector.multi_reduction <add>, %37, %cst_43 [0] : vector<256x128xf32> to vector<128xf32>
    %39 = vector.shape_cast %38 : vector<128xf32> to vector<1x128xf32>
    %40 = vector.shape_cast %39 : vector<1x128xf32> to vector<1x1x128xf32>
    %c0_44 = arith.constant 0 : index
    %c0_45 = arith.constant 0 : index
    %c0_46 = arith.constant 0 : index
    %41 = vector.load %arg5[%c0_44, %c0_45, %c0_46] : memref<1x1x128xf32, #tpu.memory_space<vmem>>, vector<1x1x128xf32>
    tpu.vector_store %arg5[%c0_44, %c0_45, %c0_46], %40 {strides = array<i32>} : memref<1x1x128xf32, #tpu.memory_space<vmem>>, vector<1x1x128xf32>,
    return
  }
  func.func @transform_0(%arg0: i32) -> (i32, i32, i32, i32) {
    %c0_i32 = arith.constant 0 : i32
    %c0_i32_0 = arith.constant 0 : i32
    %c0_i32_1 = arith.constant 0 : i32
    %c0_i32_2 = arith.constant 0 : i32
    return %arg0, %c0_i32, %c0_i32_0, %c0_i32_1 : i32, i32, i32, i32
  }
  func.func @transform_1(%arg0: i32) -> (i32, i32) {
    %c0_i32 = arith.constant 0 : i32
    %c0_i32_0 = arith.constant 0 : i32
    %c0_i32_1 = arith.constant 0 : i32
    return %c0_i32, %c0_i32_0 : i32, i32
  }
  func.func @transform_2(%arg0: i32) -> (i32, i32, i32, i32) {
    %c0_i32 = arith.constant 0 : i32
    %c0_i32_0 = arith.constant 0 : i32
    %c0_i32_1 = arith.constant 0 : i32
    %c0_i32_2 = arith.constant 0 : i32
    return %arg0, %c0_i32, %c0_i32_0, %c0_i32_1 : i32, i32, i32, i32
  }
  func.func @transform_3(%arg0: i32) -> (i32, i32, i32) {
    %c0_i32 = arith.constant 0 : i32
    %c0_i32_0 = arith.constant 0 : i32
    %c0_i32_1 = arith.constant 0 : i32
    return %arg0, %c0_i32, %c0_i32_0 : i32, i32, i32
  }
  func.func @transform_4(%arg0: i32) -> (i32, i32, i32) {
    %c0_i32 = arith.constant 0 : i32
    %c0_i32_0 = arith.constant 0 : i32
    %c0_i32_1 = arith.constant 0 : i32
    return %arg0, %c0_i32, %c0_i32_0 : i32, i32, i32
  }
}

</mosaic_0001>

<bundles_post_ra>
// kernel: tpu_custom_call.1
= control target key start
LH: loop header
LB: loop body
LE: loop exit
PB: predicated region body
PF: predicated region fallthrough
CT: control target
= control target key end

     0   :  { %10 = vsyncpa [#allocation3], 0  ;;  %s4360_s0 = inlined_call_operand.vmem [shape: f32[2,18,18,128], index: 0, kind: input, shape index: {}]   ;;  %s4361_s1 = inlined_call_operand.vmem [shape: f32[1152,128], index: 1, kind: input, shape index: {}]   ;;  %s4362_s2 = inlined_call_operand.hbm [shape: f32[2,16,16,128], index: 2, kind: output, shape index: {0}]   ;;  %s4363_s3 = inlined_call_operand.hbm [shape: f32[2,1,128], index: 3, kind: output, shape index: {1}]   ;;  %s4364_s4 = inlined_call_operand.hbm [shape: f32[2,1,128], index: 4, kind: output, shape index: {2}]  }
   0x1   :  { %12 = vsyncpa [#allocation3 + $0x1], 0 }
   0x2   :  { %13 = vsyncpa [#allocation5], 0 }
   0x3   :  { %15 = vsyncpa [#allocation5 + $0x1], 0  ;;  %s2667_s15 = smov 0   ;;  %s2669_s16 = smov 0  }
   0x4   :  { %s2671_s17 = smov 0   ;;  %s2673_s18 = smov 0  }
   0x5 LB: > { %s2688_s19 = sadd.s32 4294967295, %s2634_s18   ;;  %s2074_s20 = sadd.s32 4294967294, %s2634_s18   ;;  %s2634_s18 = sphi %s2673_s18, %s4493_s18   ;;  %s2630_s17 = sphi %s2671_s17, %s4492_s17   ;;  %s2626_s16 = sphi %s2669_s16, %s4491_s16   ;;  %s2622_s15 = sphi %s2667_s15, %s4490_s15  }
   0x6   : > { %s2692_s21 = sadd.s32 1, %s2634_s18   ;;  %s75_s22 = sadd.s32 1, %s2630_s17 }
   0x7   : > { %s72_s23 = ssub.s32 %s2634_s18, %s2692_s21  ;;  %p85_p0 = scmp.ne.s32.totalorder %s2630_s17, %s2626_s16 }
   0x8   : > { %p73_p1 = scmp.eq.s32.totalorder %s72_s23, 0  ;;  %p86_p2 = scmp.eq.s32.totalorder %s2688_s19, 1 }
   0x9   : > { %p91_p3 = scmp.ne.s32.totalorder %s2626_s16, %s2622_s15  ;;  %p92_p4 = scmp.eq.s32.totalorder %s2074_s20, 1 }
   0xa   : > { %s2705_s24 = scalar_select %p73_p1, %s2630_s17, %s75_s22  }
   0xb   : > { %p2707_p5 = por %p86_p2, %p85_p0  ;;  %p2711_p6 = por %p92_p4, %p91_p3 }
   0xc   : > { %p2077_p7 = scmp.ge.s32.totalorder %s2634_s18, 1  ;;  %p173_p8 = scmp.lt.s32.totalorder %s2634_s18, 3 }
   0xe   : > { %p174_p9 = pnand %p2077_p7, %p173_p8 }
  0x10   : > { %177 = sbr.rel (%p174_p9) target bundleno = 660 (0x294), region = 28 }
  0x15   : > { %v517_v0 = vld [vmem:[%s4361_s1 + $0x78] sm:$0xff]  ;;  %v4393_v2 = vmov 0.0   ;;  %v516_v3 = vld [vmem:[%s4361_s1 + $0x70] sm:$0xff]  ;;  %v515_v5 = vld [vmem:[%s4361_s1 + $0x68] sm:$0xff]  ;;  %p207_p10 = scmp.lt.s32.totalorder %s2688_s19, 1  ;;  %s2279_s29 = sshll.u32 %s2688_s19, 12 }
  0x16   : > { %v549_v1 = vld [vmem:[%s4361_s1 + $0x178] sm:$0xff]  ;;  %646 = vmatprep.subr.mxu0 %v4393_v2  ;;  %871 = vmatprep.subr.mxu1 %v4393_v2  ;;  %v548_v4 = vld [vmem:[%s4361_s1 + $0x170] sm:$0xff]  ;;  %v547_v6 = vld [vmem:[%s4361_s1 + $0x168] sm:$0xff]  ;;  %s4193_s7 = scalar_lea.hbm %s4362_s2, %s2279_s29  ;;  %s2637_s10 = smov [#allocation2]  }
  0x17   : > { %647 = vmatpush1.msra.mxu0 %v517_v0  ;;  %872 = vmatpush1.msra.mxu1 %v549_v1  ;;  %v514_v7 = vld [vmem:[%s4361_s1 + $0x60] sm:$0xff]  ;;  %v513_v9 = vld [vmem:[%s4361_s1 + $0x58] sm:$0xff]  ;;  %v512_v11 = vld [vmem:[%s4361_s1 + $0x50] sm:$0xff]  ;;  %s208_s9 = scalar_select %p207_p10, %s2688_s19, 1 }
  0x18   : > { %648 = vmatprep.subr.mxu0 %v4393_v2  ;;  %873 = vmatprep.subr.mxu1 %v4393_v2  ;;  %v546_v8 = vld [vmem:[%s4361_s1 + $0x160] sm:$0xff]  ;;  %v545_v10 = vld [vmem:[%s4361_s1 + $0x158] sm:$0xff]  ;;  %v544_v12 = vld [vmem:[%s4361_s1 + $0x150] sm:$0xff]  ;;  %s2522_s11 = sshll.u32 %s2637_s10, 4  ;;  %s2523_s11 = int_to_ptr.vmem [resolvable:$false] %s2522_s11 }
  0x19   : > { %649 = vmatpush1.msra.mxu0 %v516_v3  ;;  %874 = vmatpush1.msra.mxu1 %v548_v4  ;;  %v511_v13 = vld [vmem:[%s4361_s1 + $0x48] sm:$0xff]  ;;  %v510_v15 = vld [vmem:[%s4361_s1 + $0x40] sm:$0xff]  ;;  %v509_v17 = vld [vmem:[%s4361_s1 + $0x38] sm:$0xff]  ;;  %s2440_s28 = smul.u32 432, %s208_s9  ;;  %s2524_s12 = scalar_lea.vmem %s2523_s11, 8192 }
  0x1a   : > { %650 = vmatprep.subr.mxu0 %v4393_v2  ;;  %875 = vmatprep.subr.mxu1 %v4393_v2  ;;  %v543_v14 = vld [vmem:[%s4361_s1 + $0x148] sm:$0xff]  ;;  %v542_v16 = vld [vmem:[%s4361_s1 + $0x140] sm:$0xff]  ;;  %v541_v18 = vld [vmem:[%s4361_s1 + $0x138] sm:$0xff] }
  0x1b   : > { %651 = vmatpush1.msra.mxu0 %v515_v5  ;;  %876 = vmatpush1.msra.mxu1 %v547_v6  ;;  %v508_v19 = vld [vmem:[%s4361_s1 + $0x30] sm:$0xff]  ;;  %v507_v21 = vld [vmem:[%s4361_s1 + $0x28] sm:$0xff]  ;;  %v506_v23 = vld [vmem:[%s4361_s1 + $0x20] sm:$0xff]  ;;  %s2960_s13 = scalar_lea.vmem %s4360_s0, %s2440_s28 }
  0x1c   : > { %652 = vmatprep.subr.mxu0 %v4393_v2  ;;  %877 = vmatprep.subr.mxu1 %v4393_v2  ;;  %v540_v20 = vld [vmem:[%s4361_s1 + $0x130] sm:$0xff]  ;;  %v539_v22 = vld [vmem:[%s4361_s1 + $0x128] sm:$0xff]  ;;  %v538_v24 = vld [vmem:[%s4361_s1 + $0x120] sm:$0xff] }
  0x1d   : > { %653 = vmatpush1.msra.mxu0 %v514_v7  ;;  %878 = vmatpush1.msra.mxu1 %v546_v8  ;;  %v505_v25 = vld [vmem:[%s4361_s1 + $0x18] sm:$0xff]  ;;  %v504_v27 = vld [vmem:[%s4361_s1 + $0x10] sm:$0xff]  ;;  %v503_v29 = vld [vmem:[%s4361_s1 + $0x8] sm:$0xff] }
  0x1e   : > { %654 = vmatprep.subr.mxu0 %v4393_v2  ;;  %879 = vmatprep.subr.mxu1 %v4393_v2  ;;  %v537_v26 = vld [vmem:[%s4361_s1 + $0x118] sm:$0xff]  ;;  %v536_v28 = vld [vmem:[%s4361_s1 + $0x110] sm:$0xff]  ;;  %v535_v30 = vld [vmem:[%s4361_s1 + $0x108] sm:$0xff] }
  0x1f   : > { %655 = vmatpush1.msra.mxu0 %v513_v9  ;;  %880 = vmatpush1.msra.mxu1 %v545_v10  ;;  %v502_v31 = vld [vmem:[%s4361_s1] sm:$0xff]  ;;  %v533_v33 = vld [vmem:[%s4361_s1 + $0xf8] sm:$0xff]  ;;  %v532_v35 = vld [vmem:[%s4361_s1 + $0xf0] sm:$0xff] }
  0x20   : > { %656 = vmatprep.subr.mxu0 %v4393_v2  ;;  %881 = vmatprep.subr.mxu1 %v4393_v2  ;;  %v534_v32 = vld [vmem:[%s4361_s1 + $0x100] sm:$0xff]  ;;  %v565_v34 = vld [vmem:[%s4361_s1 + $0x1f8] sm:$0xff]  ;;  %v564_v36 = vld [vmem:[%s4361_s1 + $0x1f0] sm:$0xff] }
  0x21   : > { %657 = vmatpush1.msra.mxu0 %v512_v11  ;;  %882 = vmatpush1.msra.mxu1 %v544_v12  ;;  %v531_v37 = vld [vmem:[%s4361_s1 + $0xe8] sm:$0xff]  ;;  %v530_v39 = vld [vmem:[%s4361_s1 + $0xe0] sm:$0xff]  ;;  %v529_v41 = vld [vmem:[%s4361_s1 + $0xd8] sm:$0xff] }
  0x22   : > { %658 = vmatprep.subr.mxu0 %v4393_v2  ;;  %883 = vmatprep.subr.mxu1 %v4393_v2  ;;  %v563_v38 = vld [vmem:[%s4361_s1 + $0x1e8] sm:$0xff]  ;;  %v562_v40 = vld [vmem:[%s4361_s1 + $0x1e0] sm:$0xff]  ;;  %v561_v42 = vld [vmem:[%s4361_s1 + $0x1d8] sm:$0xff] }
  0x23   : > { %659 = vmatpush1.msra.mxu0 %v511_v13  ;;  %884 = vmatpush1.msra.mxu1 %v543_v14  ;;  %v528_v43 = vld [vmem:[%s4361_s1 + $0xd0] sm:$0xff]  ;;  %v527_v45 = vld [vmem:[%s4361_s1 + $0xc8] sm:$0xff]  ;;  %v526_v47 = vld [vmem:[%s4361_s1 + $0xc0] sm:$0xff] }
  0x24   : > { %660 = vmatprep.subr.mxu0 %v4393_v2  ;;  %885 = vmatprep.subr.mxu1 %v4393_v2  ;;  %v560_v44 = vld [vmem:[%s4361_s1 + $0x1d0] sm:$0xff]  ;;  %v559_v46 = vld [vmem:[%s4361_s1 + $0x1c8] sm:$0xff]  ;;  %v558_v48 = vld [vmem:[%s4361_s1 + $0x1c0] sm:$0xff] }
  0x25   : > { %661 = vmatpush1.msra.mxu0 %v510_v15  ;;  %886 = vmatpush1.msra.mxu1 %v542_v16  ;;  %v525_v49 = vld [vmem:[%s4361_s1 + $0xb8] sm:$0xff]  ;;  %v524_v51 = vld [vmem:[%s4361_s1 + $0xb0] sm:$0xff]  ;;  %v523_v53 = vld [vmem:[%s4361_s1 + $0xa8] sm:$0xff] }
  0x26   : > { %662 = vmatprep.subr.mxu0 %v4393_v2  ;;  %887 = vmatprep.subr.mxu1 %v4393_v2  ;;  %v557_v50 = vld [vmem:[%s4361_s1 + $0x1b8] sm:$0xff]  ;;  %v556_v52 = vld [vmem:[%s4361_s1 + $0x1b0] sm:$0xff]  ;;  %v555_v54 = vld [vmem:[%s4361_s1 + $0x1a8] sm:$0xff] }
  0x27   : > { %663 = vmatpush1.msra.mxu0 %v509_v17  ;;  %888 = vmatpush1.msra.mxu1 %v541_v18  ;;  %v522_v55 = vld [vmem:[%s4361_s1 + $0xa0] sm:$0xff]  ;;  %v521_v57 = vld [vmem:[%s4361_s1 + $0x98] sm:$0xff]  ;;  %v520_v59 = vld [vmem:[%s4361_s1 + $0x90] sm:$0xff] }
  0x28   : > { %664 = vmatprep.subr.mxu0 %v4393_v2  ;;  %889 = vmatprep.subr.mxu1 %v4393_v2  ;;  %v554_v56 = vld [vmem:[%s4361_s1 + $0x1a0] sm:$0xff]  ;;  %v553_v58 = vld [vmem:[%s4361_s1 + $0x198] sm:$0xff]  ;;  %v552_v60 = vld [vmem:[%s4361_s1 + $0x190] sm:$0xff] }
  0x29   : > { %665 = vmatpush1.msra.mxu0 %v508_v19  ;;  %890 = vmatpush1.msra.mxu1 %v540_v20  ;;  %v519_v61 = vld [vmem:[%s4361_s1 + $0x88] sm:$0xff]  ;;  %v518_v63 = vld [vmem:[%s4361_s1 + $0x80] sm:$0xff]  ;;  %v2080_v3 = vld [vmem:[%s2960_s13 + $0x18] sm:$0xff] }
  0x2a   : > { %666 = vmatprep.subr.mxu0 %v4393_v2  ;;  %891 = vmatprep.subr.mxu1 %v4393_v2  ;;  %v551_v62 = vld [vmem:[%s4361_s1 + $0x188] sm:$0xff]  ;;  %v550_v1 = vld [vmem:[%s4361_s1 + $0x180] sm:$0xff]  ;;  %v581_v7 = vld [vmem:[%s4361_s1 + $0x278] sm:$0xff] }
  0x2b   : > { %667 = vmatpush1.msra.mxu0 %v507_v21  ;;  %892 = vmatpush1.msra.mxu1 %v539_v22  ;;  %v244_v0 = vld [vmem:[%s2960_s13 + $0x1] sm:$0xff]  ;;  %v245_v6 = vld [vmem:[%s2960_s13 + $0x9] sm:$0xff]  ;;  %v2996_v12 = vld [vmem:[%s2960_s13 + $0x19] sm:$0xff] }
  0x2c   : > { %668 = vmatprep.subr.mxu0 %v4393_v2  ;;  %893 = vmatprep.subr.mxu1 %v4393_v2  ;;  %v212_v4 = vld [vmem:[%s2960_s13] sm:$0xff]  ;;  %v213_v9 = vld [vmem:[%s2960_s13 + $0x8] sm:$0xff]  ;;  %v580_v11 = vld [vmem:[%s4361_s1 + $0x270] sm:$0xff] }
  0x2d   : > { %669 = vmatpush1.msra.mxu0 %v506_v23  ;;  %894 = vmatpush1.msra.mxu1 %v538_v24  ;;  %v276_v5 = vld [vmem:[%s2960_s13 + $0x2] sm:$0xff]  ;;  %v277_v10 = vld [vmem:[%s2960_s13 + $0xa] sm:$0xff]  ;;  %v613_v15 = vld [vmem:[%s4361_s1 + $0x378] sm:$0xff] }
  0x2e   : > { %670 = vmatprep.subr.mxu0 %v4393_v2  ;;  %895 = vmatprep.subr.mxu1 %v4393_v2  ;;  %v2081_v8 = vld [vmem:[%s2960_s13 + $0x20] sm:$0xff]  ;;  %v3000_v13 = vld [vmem:[%s2960_s13 + $0x30] sm:$0xff]  ;;  %v579_v14 = vld [vmem:[%s4361_s1 + $0x268] sm:$0xff] }
  0x2f   : > { %671 = vmatpush1.msra.mxu0 %v505_v25  ;;  %896 = vmatpush1.msra.mxu1 %v537_v26  ;;  %v3011_v16 = vld [vmem:[%s2960_s13 + $0x1a] sm:$0xff]  ;;  %v612_v20 = vld [vmem:[%s4361_s1 + $0x370] sm:$0xff]  ;;  %v3031_v21 = vld [vmem:[%s2960_s13 + $0x22] sm:$0xff] }
  0x30   : > { %672 = vmatprep.subr.mxu0 %v4393_v2  ;;  %897 = vmatprep.subr.mxu1 %v4393_v2  ;;  %v3016_v17 = vld [vmem:[%s2960_s13 + $0x21] sm:$0xff]  ;;  %v3019_v18 = vld [vmem:[%s2960_s13 + $0x38] sm:$0xff] }
  0x31   : > { %673 = vmatpush1.msra.mxu0 %v504_v27  ;;  %898 = vmatpush1.msra.mxu1 %v536_v28  ;;  %v578_v19 = vld [vmem:[%s4361_s1 + $0x260] sm:$0xff]  ;;  %v3035_v22 = vld [vmem:[%s2960_s13 + $0x31] sm:$0xff]  ;;  %v3038_v23 = vld [vmem:[%s2960_s13 + $0x48] sm:$0xff] }
  0x32   : > { %674 = vmatprep.subr.mxu0 %v4393_v2  ;;  %899 = vmatprep.subr.mxu1 %v4393_v2  ;;  %v577_v24 = vld [vmem:[%s4361_s1 + $0x258] sm:$0xff]  ;;  %v611_v25 = vld [vmem:[%s4361_s1 + $0x368] sm:$0xff]  ;;  %v3058_v28 = vld [vmem:[%s2960_s13 + $0x50] sm:$0xff] }
  0x33   : > { %675 = vmatpush1.msra.mxu0 %v503_v29  ;;  %900 = vmatpush1.msra.mxu1 %v535_v30  ;;  %v3051_v26 = vld [vmem:[%s2960_s13 + $0x32] sm:$0xff]  ;;  %v610_v30 = vld [vmem:[%s4361_s1 + $0x360] sm:$0xff] }
  0x34   : > { %676 = vmatprep.subr.mxu0 %v4393_v2  ;;  %901 = vmatprep.subr.mxu1 %v4393_v2  ;;  %v3055_v27 = vld [vmem:[%s2960_s13 + $0x39] sm:$0xff]  ;;  %v576_v29 = vld [vmem:[%s4361_s1 + $0x250] sm:$0xff] }
  0x35   : > { %677 = vmatpush1.msra.mxu0 %v502_v31  ;;  %902 = vmatpush1.msra.mxu1 %v534_v32  ;;  %v3072_v31 = vld [vmem:[%s2960_s13 + $0x3a] sm:$0xff]  ;;  %v3076_v32 = vld [vmem:[%s2960_s13 + $0x49] sm:$0xff] }
  0x36   : > { %678 = vmatprep.subr.mxu0 %v4393_v2  ;;  %903 = vmatprep.subr.mxu1 %v4393_v2 }
  0x37   : > { %679 = vmatpush2.msra.mxu0 %v533_v33  ;;  %904 = vmatpush2.msra.mxu1 %v565_v34  ;;  %v3079_v33 = vld [vmem:[%s2960_s13 + $0x60] sm:$0xff]  ;;  %v575_v34 = vld [vmem:[%s4361_s1 + $0x248] sm:$0xff] }
  0x38   : > { %680 = vmatprep.subr.mxu0 %v4393_v2  ;;  %905 = vmatprep.subr.mxu1 %v4393_v2 }
  0x39   : > { %681 = vmatpush2.msra.mxu0 %v532_v35  ;;  %906 = vmatpush2.msra.mxu1 %v564_v36  ;;  %v609_v35 = vld [vmem:[%s4361_s1 + $0x358] sm:$0xff]  ;;  %v3093_v36 = vld [vmem:[%s2960_s13 + $0x4a] sm:$0xff] }
  0x3a   : > { %682 = vmatprep.subr.mxu0 %v4393_v2  ;;  %907 = vmatprep.subr.mxu1 %v4393_v2 }
  0x3b   : > { %683 = vmatpush2.msra.mxu0 %v531_v37  ;;  %908 = vmatpush2.msra.mxu1 %v563_v38  ;;  %v3097_v37 = vld [vmem:[%s2960_s13 + $0x51] sm:$0xff]  ;;  %v3100_v38 = vld [vmem:[%s2960_s13 + $0x68] sm:$0xff] }
  0x3c   : > { %684 = vmatprep.subr.mxu0 %v4393_v2  ;;  %909 = vmatprep.subr.mxu1 %v4393_v2 }
  0x3d   : > { %685 = vmatpush2.msra.mxu0 %v530_v39  ;;  %910 = vmatpush2.msra.mxu1 %v562_v40  ;;  %v574_v39 = vld [vmem:[%s4361_s1 + $0x240] sm:$0xff]  ;;  %v608_v40 = vld [vmem:[%s4361_s1 + $0x350] sm:$0xff] }
  0x3e   : > { %686 = vmatprep.subr.mxu0 %v4393_v2  ;;  %911 = vmatprep.subr.mxu1 %v4393_v2 }
  0x3f   : > { %687 = vmatpush2.msra.mxu0 %v529_v41  ;;  %912 = vmatpush2.msra.mxu1 %v561_v42  ;;  %v3114_v41 = vld [vmem:[%s2960_s13 + $0x52] sm:$0xff]  ;;  %v3118_v42 = vld [vmem:[%s2960_s13 + $0x61] sm:$0xff] }
  0x40   : > { %688 = vmatprep.subr.mxu0 %v4393_v2  ;;  %913 = vmatprep.subr.mxu1 %v4393_v2 }
  0x41   : > { %689 = vmatpush2.msra.mxu0 %v528_v43  ;;  %914 = vmatpush2.msra.mxu1 %v560_v44  ;;  %v3121_v43 = vld [vmem:[%s2960_s13 + $0x78] sm:$0xff] }
  0x42   : > { %690 = vmatprep.subr.mxu0 %v4393_v2  ;;  %915 = vmatprep.subr.mxu1 %v4393_v2  ;;  %v573_v44 = vld [vmem:[%s4361_s1 + $0x238] sm:$0xff] }
  0x43   : > { %691 = vmatpush2.msra.mxu0 %v527_v45  ;;  %916 = vmatpush2.msra.mxu1 %v559_v46  ;;  %v607_v45 = vld [vmem:[%s4361_s1 + $0x348] sm:$0xff] }
  0x44   : > { %692 = vmatprep.subr.mxu0 %v4393_v2  ;;  %917 = vmatprep.subr.mxu1 %v4393_v2  ;;  %v3135_v46 = vld [vmem:[%s2960_s13 + $0x62] sm:$0xff] }
  0x45   : > { %693 = vmatpush2.msra.mxu0 %v526_v47  ;;  %918 = vmatpush2.msra.mxu1 %v558_v48  ;;  %v3139_v47 = vld [vmem:[%s2960_s13 + $0x69] sm:$0xff]  ;;  %v3142_v48 = vld [vmem:[%s2960_s13 + $0x80] sm:$0xff] }
  0x46   : > { %694 = vmatprep.subr.mxu0 %v4393_v2  ;;  %919 = vmatprep.subr.mxu1 %v4393_v2 }
  0x47   : > { %695 = vmatpush2.msra.mxu0 %v525_v49  ;;  %920 = vmatpush2.msra.mxu1 %v557_v50  ;;  %v572_v49 = vld [vmem:[%s4361_s1 + $0x230] sm:$0xff]  ;;  %v606_v50 = vld [vmem:[%s4361_s1 + $0x340] sm:$0xff] }
  0x48   : > { %696 = vmatprep.subr.mxu0 %v4393_v2  ;;  %921 = vmatprep.subr.mxu1 %v4393_v2 }
  0x49   : > { %697 = vmatpush2.msra.mxu0 %v524_v51  ;;  %922 = vmatpush2.msra.mxu1 %v556_v52  ;;  %v3156_v51 = vld [vmem:[%s2960_s13 + $0x6a] sm:$0xff]  ;;  %v3160_v52 = vld [vmem:[%s2960_s13 + $0x79] sm:$0xff] }
  0x4a   : > { %698 = vmatprep.subr.mxu0 %v4393_v2  ;;  %923 = vmatprep.subr.mxu1 %v4393_v2 }
  0x4b   : > { %699 = vmatpush2.msra.mxu0 %v523_v53  ;;  %924 = vmatpush2.msra.mxu1 %v555_v54  ;;  %v3163_v53 = vld [vmem:[%s2960_s13 + $0x90] sm:$0xff]  ;;  %v571_v54 = vld [vmem:[%s4361_s1 + $0x228] sm:$0xff] }
  0x4c   : > { %700 = vmatprep.subr.mxu0 %v4393_v2  ;;  %925 = vmatprep.subr.mxu1 %v4393_v2 }
  0x4d   : > { %701 = vmatpush2.msra.mxu0 %v522_v55  ;;  %926 = vmatpush2.msra.mxu1 %v554_v56  ;;  %v605_v55 = vld [vmem:[%s4361_s1 + $0x338] sm:$0xff] }
  0x4e   : > { %702 = vmatprep.subr.mxu0 %v4393_v2  ;;  %927 = vmatprep.subr.mxu1 %v4393_v2  ;;  %v3177_v56 = vld [vmem:[%s2960_s13 + $0x7a] sm:$0xff] }
  0x4f   : > { %703 = vmatpush2.msra.mxu0 %v521_v57  ;;  %928 = vmatpush2.msra.mxu1 %v553_v58  ;;  %v3181_v57 = vld [vmem:[%s2960_s13 + $0x81] sm:$0xff]  ;;  %v3184_v58 = vld [vmem:[%s2960_s13 + $0x98] sm:$0xff] }
  0x50   : > { %704 = vmatprep.subr.mxu0 %v4393_v2  ;;  %929 = vmatprep.subr.mxu1 %v4393_v2 }
  0x51   : > { %705 = vmatpush2.msra.mxu0 %v520_v59  ;;  %930 = vmatpush2.msra.mxu1 %v552_v60  ;;  %v570_v59 = vld [vmem:[%s4361_s1 + $0x220] sm:$0xff]  ;;  %v604_v60 = vld [vmem:[%s4361_s1 + $0x330] sm:$0xff] }
  0x52   : > { %706 = vmatprep.subr.mxu0 %v4393_v2  ;;  %931 = vmatprep.subr.mxu1 %v4393_v2 }
  0x53   : > { %707 = vmatpush2.msra.mxu0 %v519_v61  ;;  %932 = vmatpush2.msra.mxu1 %v551_v62  ;;  %v3198_v61 = vld [vmem:[%s2960_s13 + $0x82] sm:$0xff]  ;;  %v3202_v62 = vld [vmem:[%s2960_s13 + $0x91] sm:$0xff] }
  0x54   : > { %708 = vmatprep.subr.mxu0 %v4393_v2  ;;  %933 = vmatprep.subr.mxu1 %v4393_v2 }
  0x55   : > { %709 = vmatpush2.msra.mxu0 %v518_v63  ;;  %710 = vmatprep.mubr.f32.mxu0 %v244_v0  ;;  %v3205_v63 = vld [vmem:[%s2960_s13 + $0xa8] sm:$0xff]  ;;  %v569_v0 = vld [vmem:[%s4361_s1 + $0x218] sm:$0xff] }
  0x56   : > { %934 = vmatpush2.msra.mxu1 %v550_v1  ;;  %935 = vmatprep.mubr.f32.mxu1 %v2080_v3  ;;  %v603_v1 = vld [vmem:[%s4361_s1 + $0x328] sm:$0xff] }
  0x57   : > { %711 = vmatmul.mubr.f32.vlgmr.msra.gmra.mxu0 %v212_v4  ;;  %936 = vmatmul.mubr.f32.vlgmr.msra.gmra.mxu1 %v276_v5  ;;  %v3223_v4 = vld [vmem:[%s2960_s13 + $0x99] sm:$0xff]  ;;  %v3226_v5 = vld [vmem:[%s2960_s13 + $0xb0] sm:$0xff] }
  0x58   : > { %1096 = vmatprep.subr.mxu0 %v4393_v2  ;;  %715 = vmatprep.mubr.f32.mxu0 %v245_v6  ;;  %v568_v6 = vld [vmem:[%s4361_s1 + $0x210] sm:$0xff] }
  0x59   : > { %1097 = vmatpush1.msra.mxu0 %v581_v7  ;;  %940 = vmatprep.mubr.f32.mxu1 %v2081_v8  ;;  %v602_v7 = vld [vmem:[%s4361_s1 + $0x320] sm:$0xff] }
  0x5a   : > { %1098 = vmatprep.subr.mxu0 %v4393_v2  ;;  %1321 = vmatprep.subr.mxu1 %v4393_v2 }
  0x5b   : > { %716 = vmatmul.mubr.f32.gmra.mxu0 %v213_v9  ;;  %941 = vmatmul.mubr.f32.gmra.mxu1 %v277_v10  ;;  %v3244_v9 = vld [vmem:[%s2960_s13 + $0xa9] sm:$0xff]  ;;  %v3247_v10 = vld [vmem:[%s2960_s13 + $0xc0] sm:$0xff] }
  0x5c   : > { %1099 = vmatpush1.msra.mxu0 %v580_v11  ;;  %720 = vmatprep.mubr.f32.mxu0 %v2996_v12  ;;  %v567_v11 = vld [vmem:[%s4361_s1 + $0x208] sm:$0xff] }
  0x5d   : > { %945 = vmatprep.mubr.f32.mxu1 %v3000_v13  ;;  %1100 = vmatprep.subr.mxu0 %v4393_v2 }
  0x5e   : > { %1101 = vmatpush1.msra.mxu0 %v579_v14  ;;  %1322 = vmatpush1.msra.mxu1 %v613_v15  ;;  %v601_v14 = vld [vmem:[%s4361_s1 + $0x318] sm:$0xff]  ;;  %v3261_v15 = vld [vmem:[%s2960_s13 + $0xaa] sm:$0xff] }
  0x5f   : > { %721 = vmatmul.mubr.f32.gmra.mxu0 %v2080_v3  ;;  %946 = vmatmul.mubr.f32.gmra.mxu1 %v3011_v16  ;;  %v3219_v3 = vld [vmem:[%s2960_s13 + $0x92] sm:$0xff] }
  0x60   : > { %725 = vmatprep.mubr.f32.mxu0 %v3016_v17  ;;  %950 = vmatprep.mubr.f32.mxu1 %v3019_v18 }
  0x61   : > { %1102 = vmatprep.subr.mxu0 %v4393_v2  ;;  %1323 = vmatprep.subr.mxu1 %v4393_v2 }
  0x62   : > { %1103 = vmatpush1.msra.mxu0 %v578_v19  ;;  %1324 = vmatpush1.msra.mxu1 %v612_v20  ;;  %v3265_v19 = vld [vmem:[%s2960_s13 + $0xb1] sm:$0xff]  ;;  %v3268_v20 = vld [vmem:[%s2960_s13 + $0xc8] sm:$0xff] }
  0x63   : > { %726 = vmatmul.mubr.f32.gmra.mxu0 %v2081_v8  ;;  %951 = vmatmul.mubr.f32.gmra.mxu1 %v3031_v21  ;;  %v3240_v8 = vld [vmem:[%s2960_s13 + $0x9a] sm:$0xff] }
  0x64   : > { %730 = vmatprep.mubr.f32.mxu0 %v3035_v22  ;;  %955 = vmatprep.mubr.f32.mxu1 %v3038_v23 }
  0x65   : > { %1104 = vmatprep.subr.mxu0 %v4393_v2  ;;  %1325 = vmatprep.subr.mxu1 %v4393_v2 }
  0x66   : > { %1105 = vmatpush1.msra.mxu0 %v577_v24  ;;  %1326 = vmatpush1.msra.mxu1 %v611_v25  ;;  %v566_v24 = vld [vmem:[%s4361_s1 + $0x200] sm:$0xff]  ;;  %v600_v25 = vld [vmem:[%s4361_s1 + $0x310] sm:$0xff] }
  0x67   : > { %731 = vmatmul.mubr.f32.gmra.mxu0 %v3000_v13  ;;  %956 = vmatmul.mubr.f32.gmra.mxu1 %v3051_v26 }
  0x68   : > { %735 = vmatprep.mubr.f32.mxu0 %v3055_v27  ;;  %960 = vmatprep.mubr.f32.mxu1 %v3058_v28 }
  0x69   : > { %1106 = vmatprep.subr.mxu0 %v4393_v2  ;;  %1327 = vmatprep.subr.mxu1 %v4393_v2 }
  0x6a   : > { %1107 = vmatpush1.msra.mxu0 %v576_v29  ;;  %1328 = vmatpush1.msra.mxu1 %v610_v30  ;;  %v3282_v29 = vld [vmem:[%s2960_s13 + $0xb2] sm:$0xff]  ;;  %v3286_v30 = vld [vmem:[%s2960_s13 + $0xc1] sm:$0xff] }
  0x6b   : > { %736 = vmatmul.mubr.f32.gmra.mxu0 %v3019_v18  ;;  %961 = vmatmul.mubr.f32.gmra.mxu1 %v3072_v31 }
  0x6c   : > { %740 = vmatprep.mubr.f32.mxu0 %v3076_v32  ;;  %965 = vmatprep.mubr.f32.mxu1 %v3079_v33 }
  0x6d   : > { %1108 = vmatprep.subr.mxu0 %v4393_v2  ;;  %1329 = vmatprep.subr.mxu1 %v4393_v2 }
  0x6e   : > { %1109 = vmatpush1.msra.mxu0 %v575_v34  ;;  %1330 = vmatpush1.msra.mxu1 %v609_v35  ;;  %v3289_v34 = vld [vmem:[%s2960_s13 + $0xd8] sm:$0xff] }
  0x6f   : > { %741 = vmatmul.mubr.f32.gmra.mxu0 %v3038_v23  ;;  %966 = vmatmul.mubr.f32.gmra.mxu1 %v3093_v36  ;;  %v597_v35 = vld [vmem:[%s4361_s1 + $0x2f8] sm:$0xff] }
  0x70   : > { %745 = vmatprep.mubr.f32.mxu0 %v3097_v37  ;;  %970 = vmatprep.mubr.f32.mxu1 %v3100_v38 }
  0x71   : > { %1110 = vmatprep.subr.mxu0 %v4393_v2  ;;  %1331 = vmatprep.subr.mxu1 %v4393_v2 }
  0x72   : > { %1111 = vmatpush1.msra.mxu0 %v574_v39  ;;  %1332 = vmatpush1.msra.mxu1 %v608_v40  ;;  %v599_v39 = vld [vmem:[%s4361_s1 + $0x308] sm:$0xff] }
  0x73   : > { %746 = vmatmul.mubr.f32.gmra.mxu0 %v3058_v28  ;;  %971 = vmatmul.mubr.f32.gmra.mxu1 %v3114_v41  ;;  %v3303_v40 = vld [vmem:[%s2960_s13 + $0xc2] sm:$0xff] }
  0x74   : > { %750 = vmatprep.mubr.f32.mxu0 %v3118_v42  ;;  %975 = vmatprep.mubr.f32.mxu1 %v3121_v43 }
  0x75   : > { %1112 = vmatprep.subr.mxu0 %v4393_v2  ;;  %1333 = vmatprep.subr.mxu1 %v4393_v2 }
  0x76   : > { %1113 = vmatpush1.msra.mxu0 %v573_v44  ;;  %1334 = vmatpush1.msra.mxu1 %v607_v45  ;;  %v3307_v44 = vld [vmem:[%s2960_s13 + $0xc9] sm:$0xff]  ;;  %v3310_v45 = vld [vmem:[%s2960_s13 + $0xe0] sm:$0xff] }
  0x77   : > { %751 = vmatmul.mubr.f32.gmra.mxu0 %v3079_v33  ;;  %976 = vmatmul.mubr.f32.gmra.mxu1 %v3135_v46 }
  0x78   : > { %755 = vmatprep.mubr.f32.mxu0 %v3139_v47  ;;  %980 = vmatprep.mubr.f32.mxu1 %v3142_v48 }
  0x79   : > { %1114 = vmatprep.subr.mxu0 %v4393_v2  ;;  %1335 = vmatprep.subr.mxu1 %v4393_v2 }
  0x7a   : > { %1115 = vmatpush1.msra.mxu0 %v572_v49  ;;  %1336 = vmatpush1.msra.mxu1 %v606_v50  ;;  %v596_v49 = vld [vmem:[%s4361_s1 + $0x2f0] sm:$0xff]  ;;  %v598_v50 = vld [vmem:[%s4361_s1 + $0x300] sm:$0xff] }
  0x7b   : > { %756 = vmatmul.mubr.f32.gmra.mxu0 %v3100_v38  ;;  %981 = vmatmul.mubr.f32.gmra.mxu1 %v3156_v51 }
  0x7c   : > { %760 = vmatprep.mubr.f32.mxu0 %v3160_v52  ;;  %985 = vmatprep.mubr.f32.mxu1 %v3163_v53 }
  0x7d   : > { %1116 = vmatprep.subr.mxu0 %v4393_v2  ;;  %1337 = vmatprep.subr.mxu1 %v4393_v2 }
  0x7e   : > { %1117 = vmatpush1.msra.mxu0 %v571_v54  ;;  %1338 = vmatpush1.msra.mxu1 %v605_v55  ;;  %v3324_v54 = vld [vmem:[%s2960_s13 + $0xca] sm:$0xff]  ;;  %v3328_v55 = vld [vmem:[%s2960_s13 + $0xd9] sm:$0xff] }
  0x7f   : > { %761 = vmatmul.mubr.f32.gmra.mxu0 %v3121_v43  ;;  %986 = vmatmul.mubr.f32.gmra.mxu1 %v3177_v56 }
  0x80   : > { %765 = vmatprep.mubr.f32.mxu0 %v3181_v57  ;;  %990 = vmatprep.mubr.f32.mxu1 %v3184_v58 }
  0x81   : > { %1118 = vmatprep.subr.mxu0 %v4393_v2  ;;  %1339 = vmatprep.subr.mxu1 %v4393_v2 }
  0x82   : > { %1119 = vmatpush1.msra.mxu0 %v570_v59  ;;  %1340 = vmatpush1.msra.mxu1 %v604_v60  ;;  %v3331_v59 = vld [vmem:[%s2960_s13 + $0xf0] sm:$0xff]  ;;  %v595_v60 = vld [vmem:[%s4361_s1 + $0x2e8] sm:$0xff] }
  0x83   : > { %766 = vmatmul.mubr.f32.gmra.mxu0 %v3142_v48  ;;  %991 = vmatmul.mubr.f32.gmra.mxu1 %v3198_v61  ;;  %4409 = vst [vmem:[#allocation9_spill] sm:$0xff] %v3331_v59 }
  0x84   : > { %770 = vmatprep.mubr.f32.mxu0 %v3202_v62  ;;  %995 = vmatprep.mubr.f32.mxu1 %v3205_v63 }
  0x85   : > { %1120 = vmatprep.subr.mxu0 %v4393_v2  ;;  %1341 = vmatprep.subr.mxu1 %v4393_v2 }
  0x86   : > { %1121 = vmatpush1.msra.mxu0 %v569_v0  ;;  %1342 = vmatpush1.msra.mxu1 %v603_v1  ;;  %v629_v0 = vld [vmem:[%s4361_s1 + $0x3f8] sm:$0xff] }
  0x87   : > { %771 = vmatmul.mubr.f32.gmra.mxu0 %v3163_v53  ;;  %996 = vmatmul.mubr.f32.gmra.mxu1 %v3219_v3  ;;  %v3345_v1 = vld [vmem:[%s2960_s13 + $0xda] sm:$0xff] }
  0x88   : > { %775 = vmatprep.mubr.f32.mxu0 %v3223_v4  ;;  %1000 = vmatprep.mubr.f32.mxu1 %v3226_v5 }
  0x89   : > { %1122 = vmatprep.subr.mxu0 %v4393_v2  ;;  %1343 = vmatprep.subr.mxu1 %v4393_v2 }
  0x8a   : > { %1123 = vmatpush1.msra.mxu0 %v568_v6  ;;  %1344 = vmatpush1.msra.mxu1 %v602_v7  ;;  %v3349_v6 = vld [vmem:[%s2960_s13 + $0xe1] sm:$0xff]  ;;  %v3352_v7 = vld [vmem:[%s2960_s13 + $0xf8] sm:$0xff] }
  0x8b   : > { %776 = vmatmul.mubr.f32.gmra.mxu0 %v3184_v58  ;;  %1001 = vmatmul.mubr.f32.gmra.mxu1 %v3240_v8  ;;  %4410 = vst [vmem:[#allocation10_spill] sm:$0xff] %v3352_v7 }
  0x8c   : > { %780 = vmatprep.mubr.f32.mxu0 %v3244_v9  ;;  %1005 = vmatprep.mubr.f32.mxu1 %v3247_v10 }
  0x8d   : > { %1124 = vmatprep.subr.mxu0 %v4393_v2  ;;  %1345 = vmatprep.subr.mxu1 %v4393_v2 }
  0x8e   : > { %1125 = vmatpush1.msra.mxu0 %v567_v11  ;;  %1346 = vmatpush1.msra.mxu1 %v601_v14  ;;  %v594_v11 = vld [vmem:[%s4361_s1 + $0x2e0] sm:$0xff]  ;;  %v628_v14 = vld [vmem:[%s4361_s1 + $0x3f0] sm:$0xff] }
  0x8f   : > { %781 = vmatmul.mubr.f32.gmra.mxu0 %v3205_v63  ;;  %1006 = vmatmul.mubr.f32.gmra.mxu1 %v3261_v15 }
  0x90   : > { %785 = vmatprep.mubr.f32.mxu0 %v3265_v19  ;;  %1010 = vmatprep.mubr.f32.mxu1 %v3268_v20 }
  0x91   : > { %1126 = vmatprep.subr.mxu0 %v4393_v2  ;;  %1347 = vmatprep.subr.mxu1 %v4393_v2 }
  0x92   : > { %1127 = vmatpush1.msra.mxu0 %v566_v24  ;;  %1348 = vmatpush1.msra.mxu1 %v600_v25  ;;  %v3366_v24 = vld [vmem:[%s2960_s13 + $0xe2] sm:$0xff]  ;;  %v3370_v25 = vld [vmem:[%s2960_s13 + $0xf1] sm:$0xff] }
  0x93   : > { %786 = vmatmul.mubr.f32.gmra.mxu0 %v3226_v5  ;;  %1011 = vmatmul.mubr.f32.gmra.mxu1 %v3282_v29  ;;  %4411 = vst [vmem:[#allocation11_spill] sm:$0xff] %v3366_v24 }
  0x94   : > { %790 = vmatprep.mubr.f32.mxu0 %v3286_v30  ;;  %1015 = vmatprep.mubr.f32.mxu1 %v3289_v34 }
  0x95   : > { %1128 = vmatprep.subr.mxu0 %v4393_v2  ;;  %1349 = vmatprep.subr.mxu1 %v4393_v2 }
  0x96   : > { %1129 = vmatpush2.msra.mxu0 %v597_v35  ;;  %1350 = vmatpush1.msra.mxu1 %v599_v39  ;;  %v3373_v35 = vld [vmem:[%s2960_s13 + $0x108] sm:$0xff]  ;;  %v593_v39 = vld [vmem:[%s4361_s1 + $0x2d8] sm:$0xff] }
  0x97   : > { %791 = vmatmul.mubr.f32.gmra.mxu0 %v3247_v10  ;;  %1016 = vmatmul.mubr.f32.gmra.mxu1 %v3303_v40  ;;  %4412 = vst [vmem:[#allocation12_spill] sm:$0xff] %v3373_v35 }
  0x98   : > { %795 = vmatprep.mubr.f32.mxu0 %v3307_v44  ;;  %1020 = vmatprep.mubr.f32.mxu1 %v3310_v45 }
  0x99   : > { %1130 = vmatprep.subr.mxu0 %v4393_v2  ;;  %1351 = vmatprep.subr.mxu1 %v4393_v2 }
  0x9a   : > { %1131 = vmatpush2.msra.mxu0 %v596_v49  ;;  %1352 = vmatpush1.msra.mxu1 %v598_v50  ;;  %v627_v49 = vld [vmem:[%s4361_s1 + $0x3e8] sm:$0xff]  ;;  %v3387_v50 = vld [vmem:[%s2960_s13 + $0xf2] sm:$0xff] }
  0x9b   : > { %796 = vmatmul.mubr.f32.gmra.mxu0 %v3268_v20  ;;  %1021 = vmatmul.mubr.f32.gmra.mxu1 %v3324_v54  ;;  %4413 = vst [vmem:[#allocation13_spill] sm:$0xff] %v3387_v50 }
  0x9c   : > { %800 = vmatprep.mubr.f32.mxu0 %v3328_v55  ;;  %1025 = vmatprep.mubr.f32.mxu1 %v3331_v59 }
  0x9d   : > { %1132 = vmatprep.subr.mxu0 %v4393_v2  ;;  %1353 = vmatprep.subr.mxu1 %v4393_v2 }
  0x9e   : > { %1133 = vmatpush2.msra.mxu0 %v595_v60  ;;  %1354 = vmatpush2.msra.mxu1 %v629_v0  ;;  %v3391_v60 = vld [vmem:[%s2960_s13 + $0xf9] sm:$0xff]  ;;  %v3394_v0 = vld [vmem:[%s2960_s13 + $0x110] sm:$0xff] }
  0x9f   : > { %801 = vmatmul.mubr.f32.gmra.mxu0 %v3289_v34  ;;  %1026 = vmatmul.mubr.f32.gmra.mxu1 %v3345_v1  ;;  %4414 = vst [vmem:[#allocation14_spill] sm:$0xff] %v3391_v60  ;;  %4415 = vst [vmem:[#allocation15_spill] sm:$0xff] %v3394_v0 }
  0xa0   : > { %805 = vmatprep.mubr.f32.mxu0 %v3349_v6  ;;  %1030 = vmatprep.mubr.f32.mxu1 %v3352_v7 }
  0xa1   : > { %1134 = vmatprep.subr.mxu0 %v4393_v2  ;;  %1355 = vmatprep.subr.mxu1 %v4393_v2 }
  0xa2   : > { %1135 = vmatpush2.msra.mxu0 %v594_v11  ;;  %1356 = vmatpush2.msra.mxu1 %v628_v14  ;;  %v592_v11 = vld [vmem:[%s4361_s1 + $0x2d0] sm:$0xff]  ;;  %v626_v14 = vld [vmem:[%s4361_s1 + $0x3e0] sm:$0xff] }
  0xa3   : > { %806 = vmatmul.mubr.f32.gmra.mxu0 %v3310_v45  ;;  %1031 = vmatmul.mubr.f32.gmra.mxu1 %v3366_v24  ;;  %v625_v24 = vld [vmem:[%s4361_s1 + $0x3d8] sm:$0xff] }
  0xa4   : > { %810 = vmatprep.mubr.f32.mxu0 %v3370_v25  ;;  %1035 = vmatprep.mubr.f32.mxu1 %v3373_v35 }
  0xa5   : > { %1136 = vmatprep.subr.mxu0 %v4393_v2  ;;  %1357 = vmatprep.subr.mxu1 %v4393_v2 }
  0xa6   : > { %1137 = vmatpush2.msra.mxu0 %v593_v39  ;;  %1358 = vmatpush2.msra.mxu1 %v627_v49  ;;  %v3408_v39 = vld [vmem:[%s2960_s13 + $0xfa] sm:$0xff]  ;;  %v3412_v49 = vld [vmem:[%s2960_s13 + $0x109] sm:$0xff] }
  0xa7   : > { %811 = vmatmul.mubr.f32.gmra.mxu0 %v3331_v59  ;;  %1036 = vmatmul.mubr.f32.gmra.mxu1 %v3387_v50  ;;  %4416 = vst [vmem:[#allocation16_spill] sm:$0xff] %v3408_v39  ;;  %4417 = vst [vmem:[#allocation17_spill] sm:$0xff] %v3412_v49  ;;  %v3415_v50 = vld [vmem:[%s2960_s13 + $0x120] sm:$0xff] }
  0xa8   : > { %815 = vmatprep.mubr.f32.mxu0 %v3391_v60  ;;  %1040 = vmatprep.mubr.f32.mxu1 %v3394_v0  ;;  %4418 = vst [vmem:[#allocation18_spill] sm:$0xff] %v3415_v50  ;;  %v591_v60 = vld [vmem:[%s4361_s1 + $0x2c8] sm:$0xff]  ;;  %v3576_v59 = vld [vmem:[%s2960_s13 + $0x15a] sm:$0xff] }
  0xa9   : > { %1138 = vmatprep.subr.mxu0 %v4393_v2  ;;  %1359 = vmatprep.subr.mxu1 %v4393_v2  ;;  %4438 = vst [vmem:[#allocation37_spill] sm:$0xff] %v3576_v59 }
  0xaa   : > { %1139 = vmatpush2.msra.mxu0 %v592_v11  ;;  %1360 = vmatpush2.msra.mxu1 %v626_v14  ;;  %v3429_v11 = vld [vmem:[%s2960_s13 + $0x10a] sm:$0xff] }
  0xab   : > { %816 = vmatmul.mubr.f32.gmra.mxu0 %v3352_v7  ;;  %1041 = vmatmul.mubr.f32.gmra.mxu1 %v3408_v39  ;;  %4419 = vst [vmem:[#allocation19_spill] sm:$0xff] %v3429_v11  ;;  %v3433_v14 = vld [vmem:[%s2960_s13 + $0x111] sm:$0xff]  ;;  %v3436_v39 = vld [vmem:[%s2960_s13 + $0x128] sm:$0xff] }
  0xac   : > { %820 = vmatprep.mubr.f32.mxu0 %v3412_v49  ;;  %1045 = vmatprep.mubr.f32.mxu1 %v3415_v50  ;;  %4420 = vst [vmem:[#allocation20_spill] sm:$0xff] %v3433_v14  ;;  %4421 = vst [vmem:[#allocation21_spill] sm:$0xff] %v3436_v39  ;;  %v590_v49 = vld [vmem:[%s4361_s1 + $0x2c0] sm:$0xff]  ;;  %v624_v7 = vld [vmem:[%s4361_s1 + $0x3d0] sm:$0xff] }
  0xad   : > { %1140 = vmatprep.subr.mxu0 %v4393_v2  ;;  %1361 = vmatprep.subr.mxu1 %v4393_v2 }
  0xae   : > { %1141 = vmatpush2.msra.mxu0 %v591_v60  ;;  %1362 = vmatpush2.msra.mxu1 %v625_v24  ;;  %v3450_v60 = vld [vmem:[%s2960_s13 + $0x112] sm:$0xff]  ;;  %v3454_v24 = vld [vmem:[%s2960_s13 + $0x121] sm:$0xff] }
  0xaf   : > { %821 = vmatmul.mubr.f32.gmra.mxu0 %v3373_v35  ;;  %1046 = vmatmul.mubr.f32.gmra.mxu1 %v3429_v11  ;;  %4422 = vst [vmem:[#allocation22_spill] sm:$0xff] %v3450_v60  ;;  %4423 = vst [vmem:[#allocation23_spill] sm:$0xff] %v3454_v24  ;;  %v3457_v11 = vld [vmem:[%s2960_s13 + $0x138] sm:$0xff]  ;;  %v623_v35 = vld [vmem:[%s4361_s1 + $0x3c8] sm:$0xff] }
  0xb0   : > { %825 = vmatprep.mubr.f32.mxu0 %v3433_v14  ;;  %1050 = vmatprep.mubr.f32.mxu1 %v3436_v39  ;;  %4424 = vst [vmem:[#allocation24_spill] sm:$0xff] %v3457_v11  ;;  %v589_v14 = vld [vmem:[%s4361_s1 + $0x2b8] sm:$0xff] }
  0xb1   : > { %1142 = vmatprep.subr.mxu0 %v4393_v2  ;;  %1363 = vmatprep.subr.mxu1 %v4393_v2 }
  0xb2   : > { %1143 = vmatpush2.msra.mxu0 %v590_v49  ;;  %1364 = vmatpush2.msra.mxu1 %v624_v7  ;;  %v3471_v49 = vld [vmem:[%s2960_s13 + $0x122] sm:$0xff] }
  0xb3   : > { %826 = vmatmul.mubr.f32.gmra.mxu0 %v3394_v0  ;;  %1051 = vmatmul.mubr.f32.gmra.mxu1 %v3450_v60  ;;  %4425 = vst [vmem:[#allocation25_spill] sm:$0xff] %v3471_v49  ;;  %v3475_v7 = vld [vmem:[%s2960_s13 + $0x129] sm:$0xff]  ;;  %v3478_v60 = vld [vmem:[%s2960_s13 + $0x140] sm:$0xff] }
  0xb4   : > { %830 = vmatprep.mubr.f32.mxu0 %v3454_v24  ;;  %1055 = vmatprep.mubr.f32.mxu1 %v3457_v11  ;;  %4426 = vst [vmem:[#allocation26_spill] sm:$0xff] %v3475_v7  ;;  %4427 = vst [vmem:[#allocation27_spill] sm:$0xff] %v3478_v60  ;;  %v588_v24 = vld [vmem:[%s4361_s1 + $0x2b0] sm:$0xff]  ;;  %v622_v0 = vld [vmem:[%s4361_s1 + $0x3c0] sm:$0xff] }
  0xb5   : > { %1144 = vmatprep.subr.mxu0 %v4393_v2  ;;  %1365 = vmatprep.subr.mxu1 %v4393_v2 }
  0xb6   : > { %1145 = vmatpush2.msra.mxu0 %v589_v14  ;;  %1366 = vmatpush2.msra.mxu1 %v623_v35  ;;  %v3492_v14 = vld [vmem:[%s2960_s13 + $0x12a] sm:$0xff]  ;;  %v3496_v35 = vld [vmem:[%s2960_s13 + $0x139] sm:$0xff] }
  0xb7   : > { %831 = vmatmul.mubr.f32.gmra.mxu0 %v3415_v50  ;;  %1056 = vmatmul.mubr.f32.gmra.mxu1 %v3471_v49  ;;  %4428 = vst [vmem:[#allocation28_spill] sm:$0xff] %v3492_v14  ;;  %4429 = vst [vmem:[#allocation29_spill] sm:$0xff] %v3496_v35  ;;  %v3499_v49 = vld [vmem:[%s2960_s13 + $0x150] sm:$0xff]  ;;  %v621_v50 = vld [vmem:[%s4361_s1 + $0x3b8] sm:$0xff] }
  0xb8   : > { %835 = vmatprep.mubr.f32.mxu0 %v3475_v7  ;;  %1060 = vmatprep.mubr.f32.mxu1 %v3478_v60  ;;  %4430 = vst [vmem:[#allocation30_spill] sm:$0xff] %v3499_v49  ;;  %v587_v7 = vld [vmem:[%s4361_s1 + $0x2a8] sm:$0xff] }
  0xb9   : > { %1146 = vmatprep.subr.mxu0 %v4393_v2  ;;  %1367 = vmatprep.subr.mxu1 %v4393_v2 }
  0xba   : > { %1147 = vmatpush2.msra.mxu0 %v588_v24  ;;  %1368 = vmatpush2.msra.mxu1 %v622_v0  ;;  %v3513_v24 = vld [vmem:[%s2960_s13 + $0x13a] sm:$0xff] }
  0xbb   : > { %836 = vmatmul.mubr.f32.gmra.mxu0 %v3436_v39  ;;  %1061 = vmatmul.mubr.f32.gmra.mxu1 %v3492_v14  ;;  %4431 = vst [vmem:[#allocation31_spill] sm:$0xff] %v3513_v24  ;;  %v3517_v0 = vld [vmem:[%s2960_s13 + $0x141] sm:$0xff]  ;;  %v3520_v14 = vld [vmem:[%s2960_s13 + $0x158] sm:$0xff]  ;;  %v620_v39 = vld [vmem:[%s4361_s1 + $0x3b0] sm:$0xff] }
  0xbc   : > { %840 = vmatprep.mubr.f32.mxu0 %v3496_v35  ;;  %1065 = vmatprep.mubr.f32.mxu1 %v3499_v49  ;;  %4432 = vst [vmem:[#allocation32_spill] sm:$0xff] %v3517_v0  ;;  %v586_v35 = vld [vmem:[%s4361_s1 + $0x2a0] sm:$0xff] }
  0xbd   : > { %1148 = vmatprep.subr.mxu0 %v4393_v2  ;;  %1369 = vmatprep.subr.mxu1 %v4393_v2 }
  0xbe   : > { %1149 = vmatpush2.msra.mxu0 %v587_v7  ;;  %1370 = vmatpush2.msra.mxu1 %v621_v50  ;;  %v3534_v7 = vld [vmem:[%s2960_s13 + $0x142] sm:$0xff]  ;;  %v3538_v50 = vld [vmem:[%s2960_s13 + $0x151] sm:$0xff] }
  0xbf   : > { %841 = vmatmul.mubr.f32.gmra.mxu0 %v3457_v11  ;;  %1066 = vmatmul.mubr.f32.gmra.mxu1 %v3513_v24  ;;  %4433 = vst [vmem:[#allocation33_spill] sm:$0xff] %v3534_v7  ;;  %4434 = vst [vmem:[#allocation34_spill] sm:$0xff] %v3538_v50  ;;  %v3541_v24 = vld [vmem:[%s2960_s13 + $0x168] sm:$0xff] }
  0xc0   : > { %845 = vmatprep.mubr.f32.mxu0 %v3517_v0  ;;  %1070 = vmatprep.mubr.f32.mxu1 %v3520_v14  ;;  %v585_v0 = vld [vmem:[%s4361_s1 + $0x298] sm:$0xff]  ;;  %v619_v11 = vld [vmem:[%s4361_s1 + $0x3a8] sm:$0xff] }
  0xc1   : > { %1150 = vmatprep.subr.mxu0 %v4393_v2  ;;  %1371 = vmatprep.subr.mxu1 %v4393_v2  ;;  %v3555_v2 = vld [vmem:[%s2960_s13 + $0x152] sm:$0xff] }
  0xc2   : > { %1151 = vmatpush2.msra.mxu0 %v586_v35  ;;  %1372 = vmatpush2.msra.mxu1 %v620_v39  ;;  %4435 = vst [vmem:[#allocation35_spill] sm:$0xff] %v3555_v2  ;;  %v4436_v39 = vmov 0.0   ;;  %v3559_v35 = vld [vmem:[%s2960_s13 + $0x159] sm:$0xff] }
  0xc3   : > { %846 = vmatmul.mubr.f32.gmra.mxu0 %v3478_v60  ;;  %1071 = vmatmul.mubr.f32.gmra.mxu1 %v3534_v7  ;;  %4437 = vst [vmem:[#allocation36_spill] sm:$0xff] %v3559_v35  ;;  %v3562_v7 = vld [vmem:[%s2960_s13 + $0x170] sm:$0xff]  ;;  %v618_v60 = vld [vmem:[%s4361_s1 + $0x3a0] sm:$0xff] }
  0xc4   : > { %850 = vmatprep.mubr.f32.mxu0 %v3538_v50  ;;  %1075 = vmatprep.mubr.f32.mxu1 %v3541_v24  ;;  %v584_v50 = vld [vmem:[%s4361_s1 + $0x290] sm:$0xff] }
  0xc5   : > { %1152 = vmatprep.subr.mxu0 %v4436_v39  ;;  %1373 = vmatprep.subr.mxu1 %v4436_v39 }
  0xc6   : > { %1153 = vmatpush2.msra.mxu0 %v585_v0  ;;  %1374 = vmatpush2.msra.mxu1 %v619_v11  ;;  %v3581_v11 = vld [vmem:[%s2960_s13 + $0x169] sm:$0xff]  ;;  %v3584_v0 = vld [vmem:[%s2960_s13 + $0x180] sm:$0xff] }
  0xc7   : > { %851 = vmatmul.mubr.f32.gmra.mxu0 %v3499_v49  ;;  %1076 = vmatmul.mubr.f32.gmra.mxu1 %v3555_v2  ;;  %4439 = vst [vmem:[#allocation38_spill] sm:$0xff] %v3584_v0  ;;  %v583_v2 = vld [vmem:[%s4361_s1 + $0x288] sm:$0xff] }
  0xc8   : > { %855 = vmatprep.mubr.f32.mxu0 %v3559_v35  ;;  %1080 = vmatprep.mubr.f32.mxu1 %v3562_v7  ;;  %v617_v35 = vld [vmem:[%s4361_s1 + $0x398] sm:$0xff]  ;;  %v3597_v49 = vld [vmem:[%s2960_s13 + $0x16a] sm:$0xff] }
  0xc9   : > { %1154 = vmatprep.subr.mxu0 %v4436_v39  ;;  %1375 = vmatprep.subr.mxu1 %v4436_v39 }
  0xca   : > { %1155 = vmatpush2.msra.mxu0 %v584_v50  ;;  %1376 = vmatpush2.msra.mxu1 %v618_v60  ;;  %v3602_v60 = vld [vmem:[%s2960_s13 + $0x171] sm:$0xff]  ;;  %v3605_v50 = vld [vmem:[%s2960_s13 + $0x188] sm:$0xff] }
  0xcb   : > { %856 = vmatmul.mubr.f32.gmra.mxu0 %v3520_v14  ;;  %1081 = vmatmul.mubr.f32.gmra.mxu1 %v3576_v59  ;;  %4440 = vst [vmem:[#allocation39_spill] sm:$0xff] %v3605_v50  ;;  %v616_v59 = vld [vmem:[%s4361_s1 + $0x390] sm:$0xff] }
  0xcc   : > { %860 = vmatprep.mubr.f32.mxu0 %v3581_v11  ;;  %1085 = vmatprep.mubr.f32.mxu1 %v3584_v0  ;;  %v3615_v0 = vld [vmem:[%s2960_s13 + $0x172] sm:$0xff] }
  0xcd   : > { %1156 = vmatprep.subr.mxu0 %v4436_v39  ;;  %1377 = vmatprep.subr.mxu1 %v4436_v39 }
  0xce   : > { %1157 = vmatpush2.msra.mxu0 %v583_v2  ;;  %1378 = vmatpush2.msra.mxu1 %v617_v35  ;;  %v582_v2 = vld [vmem:[%s4361_s1 + $0x280] sm:$0xff]  ;;  %v615_v35 = vld [vmem:[%s4361_s1 + $0x388] sm:$0xff] }
  0xcf   : > { %861 = vmatmul.mubr.f32.gmra.mxu0 %v3541_v24  ;;  %1086 = vmatmul.mubr.f32.gmra.mxu1 %v3597_v49 }
  0xd0   : > { %1379 = vmatprep.subr.mxu1 %v4436_v39  ;;  %865 = vmatprep.mubr.f32.mxu0 %v3602_v60 }
  0xd1   : > { %1090 = vmatprep.mubr.f32.mxu1 %v3605_v50  ;;  %1380 = vmatpush2.msra.mxu1 %v616_v59  ;;  %v614_v59 = vld [vmem:[%s4361_s1 + $0x380] sm:$0xff]  ;;  %v645_v50 = vld [vmem:[%s4361_s1 + $0x478] sm:$0xff] }
  0xd2   : > { %1158 = vmatprep.subr.mxu0 %v4436_v39  ;;  %1381 = vmatprep.subr.mxu1 %v4436_v39 }
  0xd3   : > { %866 = vmatmul.mubr.f32.gmra.mxu0 %v3562_v7  ;;  %1091 = vmatmul.mubr.f32.gmra.mxu1 %v3615_v0 }
  0xd4   : > { %1159 = vmatpush2.msra.mxu0 %v582_v2  ;;  %1382 = vmatpush2.msra.mxu1 %v615_v35  ;;  %v644_v2 = vld [vmem:[%s4361_s1 + $0x470] sm:$0xff] }
  0xd5   : > { %1383 = vmatprep.subr.mxu1 %v4436_v39  ;;  %1160 = vmatprep.mubr.f32.mxu0 %v3011_v16  ;;  %v641_v16 = vld [vmem:[%s4361_s1 + $0x458] sm:$0xff] }
  0xd6   : > { %1384 = vmatpush2.msra.mxu1 %v614_v59  ;;  %1385 = vmatprep.mubr.f32.mxu1 %v3035_v22 }
  0xd7   : > { %1161 = vmatmul.mubr.f32.vlgmr.msra.gmra.mxu0 %v2996_v12  ;;  %1386 = vmatmul.mubr.f32.vlgmr.msra.gmra.mxu1 %v3000_v13  ;;  %v643_v12 = vld [vmem:[%s4361_s1 + $0x468] sm:$0xff]  ;;  %v642_v13 = vld [vmem:[%s4361_s1 + $0x460] sm:$0xff] }
  0xd8   : > { %2328 = vmatprep.subr.mxu0 %v645_v50  ;;  %1165 = vmatprep.mubr.f32.mxu0 %v3031_v21  ;;  %v638_v21 = vld [vmem:[%s4361_s1 + $0x440] sm:$0xff] }
  0xd9   : > { %2329 = vmatpush3.msra.mxu0 %v645_v50  ;;  %1390 = vmatprep.mubr.f32.mxu1 %v3055_v27 }
  0xda   : > { %2330 = vmatprep.subr.mxu0 %v644_v2  ;;  %2408 = vmatprep.subr.mxu1 %v645_v50 }
  0xdb   : > { %1166 = vmatmul.mubr.f32.gmra.mxu0 %v3016_v17  ;;  %1391 = vmatmul.mubr.f32.gmra.mxu1 %v3019_v18  ;;  %v640_v17 = vld [vmem:[%s4361_s1 + $0x450] sm:$0xff]  ;;  %v639_v18 = vld [vmem:[%s4361_s1 + $0x448] sm:$0xff] }
  0xdc   : > { %1170 = vmatprep.mubr.f32.mxu0 %v3051_v26  ;;  %1395 = vmatprep.mubr.f32.mxu1 %v3076_v32  ;;  %v635_v26 = vld [vmem:[%s4361_s1 + $0x428] sm:$0xff] }
  0xdd   : > { %2331 = vmatpush3.msra.mxu0 %v644_v2  ;;  %2424 = vmatpush3.msra.mxu1 %v645_v50 }
  0xde   : > { %2332 = vmatprep.subr.mxu0 %v643_v12  ;;  %2409 = vmatprep.subr.mxu1 %v644_v2 }
  0xdf   : > { %1171 = vmatmul.mubr.f32.gmra.mxu0 %v3035_v22  ;;  %1396 = vmatmul.mubr.f32.gmra.mxu1 %v3038_v23  ;;  %v637_v22 = vld [vmem:[%s4361_s1 + $0x438] sm:$0xff]  ;;  %v636_v23 = vld [vmem:[%s4361_s1 + $0x430] sm:$0xff] }
  0xe0   : > { %1175 = vmatprep.mubr.f32.mxu0 %v3072_v31  ;;  %1400 = vmatprep.mubr.f32.mxu1 %v3097_v37  ;;  %v632_v31 = vld [vmem:[%s4361_s1 + $0x410] sm:$0xff] }
  0xe1   : > { %2333 = vmatpush3.msra.mxu0 %v643_v12  ;;  %2425 = vmatpush3.msra.mxu1 %v644_v2  ;;  %v4453_v2 = vld [vmem:[#allocation18_spill] sm:$0xff] }
  0xe2   : > { %2334 = vmatprep.subr.mxu0 %v642_v13  ;;  %2410 = vmatprep.subr.mxu1 %v643_v12 }
  0xe3   : > { %1176 = vmatmul.mubr.f32.gmra.mxu0 %v3055_v27  ;;  %1401 = vmatmul.mubr.f32.gmra.mxu1 %v3058_v28  ;;  %v634_v27 = vld [vmem:[%s4361_s1 + $0x420] sm:$0xff]  ;;  %v633_v28 = vld [vmem:[%s4361_s1 + $0x418] sm:$0xff] }
  0xe4   : > { %1180 = vmatprep.mubr.f32.mxu0 %v3093_v36  ;;  %1405 = vmatprep.mubr.f32.mxu1 %v3118_v42 }
  0xe5   : > { %2335 = vmatpush3.msra.mxu0 %v642_v13  ;;  %2426 = vmatpush3.msra.mxu1 %v643_v12  ;;  %v2497_v12 = vld [vmem:[%s2960_s13 + $0x49] sm:$0xff] }
  0xe6   : > { %2336 = vmatprep.subr.mxu0 %v641_v16  ;;  %2411 = vmatprep.subr.mxu1 %v642_v13 }
  0xe7   : > { %1181 = vmatmul.mubr.f32.gmra.mxu0 %v3076_v32  ;;  %1406 = vmatmul.mubr.f32.gmra.mxu1 %v3079_v33  ;;  %v631_v32 = vld [vmem:[%s4361_s1 + $0x408] sm:$0xff]  ;;  %v630_v33 = vld [vmem:[%s4361_s1 + $0x400] sm:$0xff] }
  0xe8   : > { %1185 = vmatprep.mubr.f32.mxu0 %v3114_v41  ;;  %1410 = vmatprep.mubr.f32.mxu1 %v3139_v47  ;;  %v2493_v41 = vld [vmem:[%s2960_s13 + $0x19] sm:$0xff] }
  0xe9   : > { %2337 = vmatpush3.msra.mxu0 %v641_v16  ;;  %2427 = vmatpush3.msra.mxu1 %v642_v13 }
  0xea   : > { %2338 = vmatprep.subr.mxu0 %v640_v17  ;;  %2412 = vmatprep.subr.mxu1 %v641_v16 }
  0xeb   : > { %1186 = vmatmul.mubr.f32.gmra.mxu0 %v3097_v37  ;;  %1411 = vmatmul.mubr.f32.gmra.mxu1 %v3100_v38  ;;  %v4441_v38 = vld [vmem:[#allocation9_spill] sm:$0xff] }
  0xec   : > { %1190 = vmatprep.mubr.f32.mxu0 %v3135_v46  ;;  %1415 = vmatprep.mubr.f32.mxu1 %v3160_v52  ;;  %v4443_v46 = vld [vmem:[#allocation14_spill] sm:$0xff] }
  0xed   : > { %2339 = vmatpush3.msra.mxu0 %v640_v17  ;;  %2428 = vmatpush3.msra.mxu1 %v641_v16  ;;  %v4454_v16 = vld [vmem:[#allocation22_spill] sm:$0xff] }
  0xee   : > { %2340 = vmatprep.subr.mxu0 %v639_v18  ;;  %2413 = vmatprep.subr.mxu1 %v640_v17 }
  0xef   : > { %1191 = vmatmul.mubr.f32.gmra.mxu0 %v3118_v42  ;;  %1416 = vmatmul.mubr.f32.gmra.mxu1 %v3121_v43  ;;  %v4442_v43 = vld [vmem:[#allocation11_spill] sm:$0xff] }
  0xf0   : > { %1195 = vmatprep.mubr.f32.mxu0 %v3156_v51  ;;  %1420 = vmatprep.mubr.f32.mxu1 %v3181_v57 }
  0xf1   : > { %2341 = vmatpush3.msra.mxu0 %v639_v18  ;;  %2429 = vmatpush3.msra.mxu1 %v640_v17  ;;  %v4455_v17 = vld [vmem:[#allocation26_spill] sm:$0xff] }
  0xf2   : > { %2342 = vmatprep.subr.mxu0 %v638_v21  ;;  %2414 = vmatprep.subr.mxu1 %v639_v18 }
  0xf3   : > { %1196 = vmatmul.mubr.f32.gmra.mxu0 %v3139_v47  ;;  %1421 = vmatmul.mubr.f32.gmra.mxu1 %v3142_v48 }
  0xf4   : > { %1200 = vmatprep.mubr.f32.mxu0 %v3177_v56  ;;  %1425 = vmatprep.mubr.f32.mxu1 %v3202_v62  ;;  %v4444_v56 = vld [vmem:[#allocation10_spill] sm:$0xff] }
  0xf5   : > { %2343 = vmatpush3.msra.mxu0 %v638_v21  ;;  %2430 = vmatpush3.msra.mxu1 %v639_v18 }
  0xf6   : > { %2344 = vmatprep.subr.mxu0 %v637_v22  ;;  %2415 = vmatprep.subr.mxu1 %v638_v21 }
  0xf7   : > { %1201 = vmatmul.mubr.f32.gmra.mxu0 %v3160_v52  ;;  %1426 = vmatmul.mubr.f32.gmra.mxu1 %v3163_v53 }
  0xf8   : > { %1205 = vmatprep.mubr.f32.mxu0 %v3198_v61  ;;  %1430 = vmatprep.mubr.f32.mxu1 %v3223_v4  ;;  %v4445_v61 = vld [vmem:[#allocation13_spill] sm:$0xff] }
  0xf9   : > { %2345 = vmatpush3.msra.mxu0 %v637_v22  ;;  %2431 = vmatpush3.msra.mxu1 %v638_v21 }
  0xfa   : > { %2346 = vmatprep.subr.mxu0 %v636_v23  ;;  %2416 = vmatprep.subr.mxu1 %v637_v22 }
  0xfb   : > { %1206 = vmatmul.mubr.f32.gmra.mxu0 %v3181_v57  ;;  %1431 = vmatmul.mubr.f32.gmra.mxu1 %v3184_v58  ;;  %v2494_v57 = vld [vmem:[%s2960_s13 + $0x21] sm:$0xff] }
  0xfc   : > { %1210 = vmatprep.mubr.f32.mxu0 %v3219_v3  ;;  %1435 = vmatprep.mubr.f32.mxu1 %v3244_v9 }
  0xfd   : > { %2347 = vmatpush3.msra.mxu0 %v636_v23  ;;  %2432 = vmatpush3.msra.mxu1 %v637_v22 }
  0xfe   : > { %2348 = vmatprep.subr.mxu0 %v635_v26  ;;  %2417 = vmatprep.subr.mxu1 %v636_v23 }
  0xff   : > { %1211 = vmatmul.mubr.f32.gmra.mxu0 %v3202_v62  ;;  %1436 = vmatmul.mubr.f32.gmra.mxu1 %v3205_v63  ;;  %v4446_v62 = vld [vmem:[#allocation17_spill] sm:$0xff] }
 0x100   : > { %1215 = vmatprep.mubr.f32.mxu0 %v3240_v8  ;;  %1440 = vmatprep.mubr.f32.mxu1 %v3265_v19 }
 0x101   : > { %2349 = vmatpush3.msra.mxu0 %v635_v26  ;;  %2433 = vmatpush3.msra.mxu1 %v636_v23 }
 0x102   : > { %2350 = vmatprep.subr.mxu0 %v634_v27  ;;  %2418 = vmatprep.subr.mxu1 %v635_v26 }
 0x103   : > { %1216 = vmatmul.mubr.f32.gmra.mxu0 %v3223_v4  ;;  %1441 = vmatmul.mubr.f32.gmra.mxu1 %v3226_v5 }
 0x104   : > { %1220 = vmatprep.mubr.f32.mxu0 %v3261_v15  ;;  %1445 = vmatprep.mubr.f32.mxu1 %v3286_v30 }
 0x105   : > { %2351 = vmatpush3.msra.mxu0 %v634_v27  ;;  %2434 = vmatpush3.msra.mxu1 %v635_v26 }
 0x106   : > { %2352 = vmatprep.subr.mxu0 %v633_v28  ;;  %2419 = vmatprep.subr.mxu1 %v634_v27 }
 0x107   : > { %1221 = vmatmul.mubr.f32.gmra.mxu0 %v3244_v9  ;;  %1446 = vmatmul.mubr.f32.gmra.mxu1 %v3247_v10  ;;  %v4447_v9 = vld [vmem:[#allocation12_spill] sm:$0xff]  ;;  %v2495_v10 = vld [vmem:[%s2960_s13 + $0x31] sm:$0xff] }
 0x108   : > { %1225 = vmatprep.mubr.f32.mxu0 %v3282_v29  ;;  %1450 = vmatprep.mubr.f32.mxu1 %v3307_v44 }
 0x109   : > { %2353 = vmatpush3.msra.mxu0 %v633_v28  ;;  %2435 = vmatpush3.msra.mxu1 %v634_v27  ;;  %v4456_v27 = vld [vmem:[#allocation21_spill] sm:$0xff] }
 0x10a   : > { %2354 = vmatprep.subr.mxu0 %v632_v31  ;;  %2420 = vmatprep.subr.mxu1 %v633_v28 }
 0x10b   : > { %1226 = vmatmul.mubr.f32.gmra.mxu0 %v3265_v19  ;;  %1451 = vmatmul.mubr.f32.gmra.mxu1 %v3268_v20  ;;  %v4448_v19 = vld [vmem:[#allocation16_spill] sm:$0xff] }
 0x10c   : > { %1230 = vmatprep.mubr.f32.mxu0 %v3303_v40  ;;  %1455 = vmatprep.mubr.f32.mxu1 %v3328_v55  ;;  %v4449_v20 = vld [vmem:[#allocation20_spill] sm:$0xff] }
 0x10d   : > { %2355 = vmatpush3.msra.mxu0 %v632_v31  ;;  %2436 = vmatpush3.msra.mxu1 %v633_v28  ;;  %v2498_v28 = vld [vmem:[%s2960_s13 + $0x51] sm:$0xff] }
 0x10e   : > { %2356 = vmatprep.subr.mxu0 %v631_v32  ;;  %2421 = vmatprep.subr.mxu1 %v632_v31 }
 0x10f   : > { %1231 = vmatmul.mubr.f32.gmra.mxu0 %v3286_v30  ;;  %1456 = vmatmul.mubr.f32.gmra.mxu1 %v3289_v34 }
 0x110   : > { %1235 = vmatprep.mubr.f32.mxu0 %v3324_v54  ;;  %1460 = vmatprep.mubr.f32.mxu1 %v3349_v6  ;;  %v2496_v54 = vld [vmem:[%s2960_s13 + $0x39] sm:$0xff] }
 0x111   : > { %2357 = vmatpush3.msra.mxu0 %v631_v32  ;;  %2437 = vmatpush3.msra.mxu1 %v632_v31 }
 0x112   : > { %2358 = vmatprep.subr.mxu0 %v630_v33  ;;  %2422 = vmatprep.subr.mxu1 %v631_v32 }
 0x113   : > { %1236 = vmatmul.mubr.f32.gmra.mxu0 %v3307_v44  ;;  %1461 = vmatmul.mubr.f32.gmra.mxu1 %v3310_v45  ;;  %v4450_v45 = vld [vmem:[#allocation15_spill] sm:$0xff] }
 0x114   : > { %1240 = vmatprep.mubr.f32.mxu0 %v3345_v1  ;;  %1465 = vmatprep.mubr.f32.mxu1 %v3370_v25  ;;  %v4451_v1 = vld [vmem:[#allocation19_spill] sm:$0xff] }
 0x115   : > { %2359 = vmatpush3.msra.mxu0 %v630_v33  ;;  %2438 = vmatpush3.msra.mxu1 %v631_v32  ;;  %v4457_v32 = vld [vmem:[#allocation25_spill] sm:$0xff] }
 0x116   : > { %2423 = vmatprep.subr.mxu1 %v630_v33 }
 0x117   : > { %v712_v36 = vpop.f32.mrf.mxu0  ;;  %v937_v37 = vpop.f32.mrf.mxu1  ;;  %1241 = vmatmul.mubr.f32.gmra.mxu0 %v3328_v55  ;;  %1466 = vmatmul.mubr.f32.gmra.mxu1 %v4441_v38 }
 0x118   : > { %v713_v42 = vadd.f32 %v2493_v41, %v712_v36  ;;  %1245 = vmatprep.mubr.f32.mxu0 %v4442_v43  ;;  %1470 = vmatprep.mubr.f32.mxu1 %v4443_v46  ;;  %v4459_v43 = vld [vmem:[#allocation24_spill] sm:$0xff] }
 0x119   : > { %v714_v47 = vpop.f32.mrf.mxu0  ;;  %v939_v48 = vpop.f32.mrf.mxu1  ;;  %2439 = vmatpush3.msra.mxu1 %v630_v33  ;;  %v4458_v33 = vld [vmem:[#allocation29_spill] sm:$0xff] }
 0x11a   : > { %v3751_v51 = vadd.f32 %v937_v37, %v713_v42  ;;  %v4460_v48 = vld [vmem:[#allocation28_spill] sm:$0xff] }
 0x11b   : > { %v717_v52 = vpop.f32.mrf.mxu0  ;;  %v942_v53 = vpop.f32.mrf.mxu1  ;;  %1246 = vmatmul.mubr.f32.gmra.mxu0 %v3349_v6  ;;  %1471 = vmatmul.mubr.f32.gmra.mxu1 %v4444_v56  ;;  %v4452_v6 = vld [vmem:[#allocation23_spill] sm:$0xff] }
 0x11c   : > { %v718_v58 = vadd.f32 %v2494_v57, %v717_v52  ;;  %1250 = vmatprep.mubr.f32.mxu0 %v4445_v61  ;;  %1475 = vmatprep.mubr.f32.mxu1 %v4446_v62  ;;  %v4461_v52 = vld [vmem:[#allocation32_spill] sm:$0xff] }
 0x11d   : > { %v719_v63 = vpop.f32.mrf.mxu0  ;;  %v944_v3 = vpop.f32.mrf.mxu1 }
 0x11e   : > { %v3758_v4 = vadd.f32 %v942_v53, %v718_v58  ;;  %v2500_v63 = vld [vmem:[%s2960_s13 + $0x69] sm:$0xff] }
 0x11f   : > { %v722_v5 = vpop.f32.mrf.mxu0  ;;  %v947_v8 = vpop.f32.mrf.mxu1  ;;  %1251 = vmatmul.mubr.f32.gmra.mxu0 %v3370_v25  ;;  %1476 = vmatmul.mubr.f32.gmra.mxu1 %v4447_v9 }
 0x120   : > { %v723_v15 = vadd.f32 %v2495_v10, %v722_v5  ;;  %1255 = vmatprep.mubr.f32.mxu0 %v4448_v19  ;;  %1480 = vmatprep.mubr.f32.mxu1 %v4449_v20  ;;  %v4463_v5 = vld [vmem:[#allocation31_spill] sm:$0xff] }
 0x121   : > { %v724_v29 = vpop.f32.mrf.mxu0  ;;  %v949_v30 = vpop.f32.mrf.mxu1 }
 0x122   : > { %v3765_v34 = vadd.f32 %v947_v8, %v723_v15  ;;  %v4464_v8 = vld [vmem:[#allocation34_spill] sm:$0xff]  ;;  %v2501_v30 = vld [vmem:[%s2960_s13 + $0x79] sm:$0xff] }
 0x123   : > { %v727_v40 = vpop.f32.mrf.mxu0  ;;  %v952_v44 = vpop.f32.mrf.mxu1  ;;  %1256 = vmatmul.mubr.f32.gmra.mxu0 %v4443_v46  ;;  %1481 = vmatmul.mubr.f32.gmra.mxu1 %v4450_v45  ;;  %v2499_v46 = vld [vmem:[%s2960_s13 + $0x61] sm:$0xff]  ;;  %v4465_v29 = vld [vmem:[#allocation30_spill] sm:$0xff] }
 0x124   : > { %v728_v55 = vadd.f32 %v2496_v54, %v727_v40  ;;  %1260 = vmatprep.mubr.f32.mxu0 %v4451_v1  ;;  %1485 = vmatprep.mubr.f32.mxu1 %v4452_v6  ;;  %v4467_v45 = vld [vmem:[#allocation36_spill] sm:$0xff] }
 0x125   : > { %v729_v25 = vpop.f32.mrf.mxu0  ;;  %v954_v39 = vpop.f32.mrf.mxu1 }
 0x126   : > { %v3772_v50 = vadd.f32 %v952_v44, %v728_v55  ;;  %v4466_v44 = vld [vmem:[#allocation33_spill] sm:$0xff] }
 0x127   : > { %v732_v35 = vpop.f32.mrf.mxu0  ;;  %v957_v59 = vpop.f32.mrf.mxu1  ;;  %1261 = vmatmul.mubr.f32.gmra.mxu0 %v4446_v62  ;;  %1486 = vmatmul.mubr.f32.gmra.mxu1 %v4453_v2  ;;  %v4462_v62 = vld [vmem:[#allocation27_spill] sm:$0xff]  ;;  %v2502_v39 = vld [vmem:[%s2960_s13 + $0x81] sm:$0xff] }
 0x128   : > { %v733_v13 = vadd.f32 %v2497_v12, %v732_v35  ;;  %1265 = vmatprep.mubr.f32.mxu0 %v4454_v16  ;;  %1490 = vmatprep.mubr.f32.mxu1 %v4455_v17 }
 0x129   : > { %v734_v18 = vpop.f32.mrf.mxu0  ;;  %v959_v21 = vpop.f32.mrf.mxu1 }
 0x12a   : > { %v3779_v22 = vadd.f32 %v957_v59, %v733_v13  ;;  %v4468_v59 = vld [vmem:[#allocation35_spill] sm:$0xff]  ;;  %v4469_v21 = vld [vmem:[#allocation37_spill] sm:$0xff] }
 0x12b   : > { %v737_v23 = vpop.f32.mrf.mxu0  ;;  %v962_v26 = vpop.f32.mrf.mxu1  ;;  %1266 = vmatmul.mubr.f32.gmra.mxu0 %v4449_v20  ;;  %1491 = vmatmul.mubr.f32.gmra.mxu1 %v4456_v27  ;;  %v2503_v18 = vld [vmem:[%s2960_s13 + $0x91] sm:$0xff]  ;;  %v3822_v27 = vld [vmem:[%s2960_s13 + $0x181] sm:$0xff] }
 0x12c   : > { %v738_v31 = vadd.f32 %v2498_v28, %v737_v23  ;;  %1270 = vmatprep.mubr.f32.mxu0 %v4457_v32  ;;  %1495 = vmatprep.mubr.f32.mxu1 %v4458_v33 }
 0x12d   : > { %v739_v36 = vpop.f32.mrf.mxu0  ;;  %v964_v37 = vpop.f32.mrf.mxu1 }
 0x12e   : > { %v3786_v38 = vadd.f32 %v962_v26, %v738_v31 }
 0x12f   : > { %v742_v41 = vpop.f32.mrf.mxu0  ;;  %v967_v42 = vpop.f32.mrf.mxu1  ;;  %1271 = vmatmul.mubr.f32.gmra.mxu0 %v4452_v6  ;;  %1496 = vmatmul.mubr.f32.gmra.mxu1 %v4459_v43 }
 0x130   : > { %v743_v47 = vadd.f32 %v2499_v46, %v742_v41  ;;  %1275 = vmatprep.mubr.f32.mxu0 %v4460_v48  ;;  %1500 = vmatprep.mubr.f32.mxu1 %v4461_v52  ;;  %v3832_v41 = vld [vmem:[%s2960_s13 + $0x189] sm:$0xff] }
 0x131   : > { %v744_v53 = vpop.f32.mrf.mxu0  ;;  %v969_v56 = vpop.f32.mrf.mxu1 }
 0x132   : > { %v3793_v57 = vadd.f32 %v967_v42, %v743_v47  ;;  %v2505_v47 = vld [vmem:[%s2960_s13 + $0xa9] sm:$0xff] }
 0x133   : > { %v747_v58 = vpop.f32.mrf.mxu0  ;;  %v972_v61 = vpop.f32.mrf.mxu1  ;;  %1276 = vmatmul.mubr.f32.gmra.mxu0 %v4455_v17  ;;  %1501 = vmatmul.mubr.f32.gmra.mxu1 %v4462_v62  ;;  %v3842_v56 = vld [vmem:[%s2960_s13 + $0x182] sm:$0xff] }
 0x134   : > { %v748_v3 = vadd.f32 %v2500_v63, %v747_v58  ;;  %1280 = vmatprep.mubr.f32.mxu0 %v4463_v5  ;;  %1505 = vmatprep.mubr.f32.mxu1 %v4464_v8  ;;  %v2238_v58 = vld [vmem:[%s2960_s13 + $0x199] sm:$0xff]  ;;  %v2506_v5 = vld [vmem:[%s2960_s13 + $0xb1] sm:$0xff] }
 0x135   : > { %v749_v9 = vpop.f32.mrf.mxu0  ;;  %v974_v10 = vpop.f32.mrf.mxu1 }
 0x136   : > { %v3800_v15 = vadd.f32 %v972_v61, %v748_v3  ;;  %v4471_v3 = vld [vmem:[#allocation39_spill] sm:$0xff] }
 0x137   : > { %v752_v19 = vpop.f32.mrf.mxu0  ;;  %v977_v20 = vpop.f32.mrf.mxu1  ;;  %1281 = vmatmul.mubr.f32.gmra.mxu0 %v4458_v33  ;;  %1506 = vmatmul.mubr.f32.gmra.mxu1 %v4465_v29  ;;  %v2206_v9 = vld [vmem:[%s2960_s13 + $0x198] sm:$0xff]  ;;  %v2239_v29 = vld [vmem:[%s2960_s13 + $0x1a1] sm:$0xff] }
 0x138   : > { %v753_v40 = vadd.f32 %v2501_v30, %v752_v19  ;;  %1285 = vmatprep.mubr.f32.mxu0 %v4466_v44  ;;  %1510 = vmatprep.mubr.f32.mxu1 %v4467_v45 }
 0x139   : > { %v754_v54 = vpop.f32.mrf.mxu0  ;;  %v979_v55 = vpop.f32.mrf.mxu1 }
 0x13a   : > { %v3807_v1 = vadd.f32 %v977_v20, %v753_v40  ;;  %v3853_v20 = vld [vmem:[%s2960_s13 + $0x18a] sm:$0xff]  ;;  %v2507_v54 = vld [vmem:[%s2960_s13 + $0xc1] sm:$0xff] }
 0x13b   : > { %v757_v6 = vpop.f32.mrf.mxu0  ;;  %v982_v25 = vpop.f32.mrf.mxu1  ;;  %1286 = vmatmul.mubr.f32.gmra.mxu0 %v4461_v52  ;;  %1511 = vmatmul.mubr.f32.gmra.mxu1 %v3520_v14 }
 0x13c   : > { %v758_v35 = vadd.f32 %v2502_v39, %v757_v6  ;;  %1290 = vmatprep.mubr.f32.mxu0 %v4468_v59  ;;  %1515 = vmatprep.mubr.f32.mxu1 %v3581_v11  ;;  %v2207_v6 = vld [vmem:[%s2960_s13 + $0x1a0] sm:$0xff]  ;;  %v2256_v59 = vld [vmem:[%s2960_s13 + $0xf2] sm:$0xff] }
 0x13d   : > { %v759_v2 = vpop.f32.mrf.mxu0  ;;  %v984_v12 = vpop.f32.mrf.mxu1 }
 0x13e   : > { %v3814_v13 = vadd.f32 %v982_v25, %v758_v35  ;;  %v2240_v35 = vld [vmem:[%s2960_s13 + $0x32] sm:$0xff] }
 0x13f   : > { %v762_v16 = vpop.f32.mrf.mxu0  ;;  %v987_v17 = vpop.f32.mrf.mxu1  ;;  %1291 = vmatmul.mubr.f32.gmra.mxu0 %v4464_v8  ;;  %1516 = vmatmul.mubr.f32.gmra.mxu1 %v3541_v24  ;;  %v2504_v24 = vld [vmem:[%s2960_s13 + $0x99] sm:$0xff] }
 0x140   : > { %v763_v14 = vadd.f32 %v2503_v18, %v762_v16  ;;  %1295 = vmatprep.mubr.f32.mxu0 %v4469_v21  ;;  %1520 = vmatprep.mubr.f32.mxu1 %v3602_v60  ;;  %v2257_v21 = vld [vmem:[%s2960_s13 + $0xfa] sm:$0xff] }
 0x141   : > { %v764_v23 = vpop.f32.mrf.mxu0  ;;  %v989_v26 = vpop.f32.mrf.mxu1 }
 0x142   : > { %v3824_v28 = vadd.f32 %v987_v17, %v763_v14  ;;  %v2508_v17 = vld [vmem:[%s2960_s13 + $0xc9] sm:$0xff]  ;;  %v2241_v14 = vld [vmem:[%s2960_s13 + $0x3a] sm:$0xff] }
 0x143   : > { %v767_v31 = vpop.f32.mrf.mxu0  ;;  %v992_v32 = vpop.f32.mrf.mxu1  ;;  %1296 = vmatmul.mubr.f32.gmra.mxu0 %v4467_v45  ;;  %1521 = vmatmul.mubr.f32.gmra.mxu1 %v3562_v7  ;;  %v4470_v7 = vld [vmem:[#allocation38_spill] sm:$0xff] }
 0x144   : > { %v768_v33 = vadd.f32 %v2504_v24, %v767_v31  ;;  %1300 = vmatprep.mubr.f32.mxu0 %v3597_v49  ;;  %1525 = vmatprep.mubr.f32.mxu1 %v3822_v27  ;;  %v2242_v31 = vld [vmem:[%s2960_s13 + $0x4a] sm:$0xff] }
 0x145   : > { %v769_v36 = vpop.f32.mrf.mxu0  ;;  %v994_v37 = vpop.f32.mrf.mxu1 }
 0x146   : > { %v3834_v42 = vadd.f32 %v992_v32, %v768_v33  ;;  %v2258_v32 = vld [vmem:[%s2960_s13 + $0x10a] sm:$0xff]  ;;  %v2509_v37 = vld [vmem:[%s2960_s13 + $0xd9] sm:$0xff] }
 0x147   : > { %v772_v43 = vpop.f32.mrf.mxu0  ;;  %v997_v46 = vpop.f32.mrf.mxu1  ;;  %1301 = vmatmul.mubr.f32.gmra.mxu0 %v3581_v11  ;;  %1526 = vmatmul.mubr.f32.gmra.mxu1 %v4470_v7  ;;  %v2259_v7 = vld [vmem:[%s2960_s13 + $0x112] sm:$0xff] }
 0x148   : > { %v773_v48 = vadd.f32 %v2505_v47, %v772_v43  ;;  %1305 = vmatprep.mubr.f32.mxu0 %v3615_v0  ;;  %1530 = vmatprep.mubr.f32.mxu1 %v3832_v41 }
 0x149   : > { %v774_v49 = vpop.f32.mrf.mxu0  ;;  %v999_v53 = vpop.f32.mrf.mxu1 }
 0x14a   : > { %v3845_v61 = vadd.f32 %v997_v46, %v773_v48  ;;  %v2243_v46 = vld [vmem:[%s2960_s13 + $0x52] sm:$0xff]  ;;  %v2244_v49 = vld [vmem:[%s2960_s13 + $0x62] sm:$0xff] }
 0x14b   : > { %v777_v62 = vpop.f32.mrf.mxu0  ;;  %v1002_v63 = vpop.f32.mrf.mxu1  ;;  %1306 = vmatmul.mubr.f32.gmra.mxu0 %v3602_v60  ;;  %1531 = vmatmul.mubr.f32.gmra.mxu1 %v4471_v3  ;;  %v2260_v53 = vld [vmem:[%s2960_s13 + $0x122] sm:$0xff] }
 0x14c   : > { %v778_v0 = vadd.f32 %v2506_v5, %v777_v62  ;;  %1310 = vmatprep.mubr.f32.mxu0 %v3842_v56  ;;  %1535 = vmatprep.mubr.f32.mxu1 %v2238_v58  ;;  %v2510_v3 = vld [vmem:[%s2960_s13 + $0xe1] sm:$0xff] }
 0x14d   : > { %v779_v10 = vpop.f32.mrf.mxu0  ;;  %v1004_v19 = vpop.f32.mrf.mxu1 }
 0x14e   : > { %v3856_v30 = vadd.f32 %v1002_v63, %v778_v0  ;;  %v2245_v0 = vld [vmem:[%s2960_s13 + $0x6a] sm:$0xff] }
 0x14f   : > { %v782_v40 = vpop.f32.mrf.mxu0  ;;  %v1007_v44 = vpop.f32.mrf.mxu1  ;;  %1311 = vmatmul.mubr.f32.gmra.mxu0 %v3822_v27  ;;  %1536 = vmatmul.mubr.f32.gmra.mxu1 %v2206_v9  ;;  %v2261_v9 = vld [vmem:[%s2960_s13 + $0x12a] sm:$0xff] }
 0x150   : > { %v783_v55 = vadd.f32 %v2507_v54, %v782_v40  ;;  %1315 = vmatprep.mubr.f32.mxu0 %v3853_v20  ;;  %1540 = vmatprep.mubr.f32.mxu1 %v2239_v29  ;;  %v2246_v29 = vld [vmem:[%s2960_s13 + $0x7a] sm:$0xff] }
 0x151   : > { %v784_v25 = vpop.f32.mrf.mxu0  ;;  %v1009_v39 = vpop.f32.mrf.mxu1  ;;  %v2262_v40 = vld [vmem:[%s2960_s13 + $0x13a] sm:$0xff] }
 0x152   : > { %v3864_v2 = vadd.f32 %v1007_v44, %v783_v55  ;;  %v2247_v39 = vld [vmem:[%s2960_s13 + $0x82] sm:$0xff] }
 0x153   : > { %v787_v12 = vpop.f32.mrf.mxu0  ;;  %v1012_v16 = vpop.f32.mrf.mxu1  ;;  %1316 = vmatmul.mubr.f32.gmra.mxu0 %v3832_v41  ;;  %1541 = vmatmul.mubr.f32.gmra.mxu1 %v2207_v6  ;;  %v2511_v6 = vld [vmem:[%s2960_s13 + $0xf1] sm:$0xff] }
 0x154   : > { %v788_v18 = vadd.f32 %v2508_v17, %v787_v12  ;;  %2360 = vmatprep.mubr.f32.mxu0 %v2240_v35  ;;  %2384 = vmatprep.mubr.f32.mxu1 %v2256_v59  ;;  %v2263_v35 = vld [vmem:[%s2960_s13 + $0x142] sm:$0xff]  ;;  %v2264_v17 = vld [vmem:[%s2960_s13 + $0x152] sm:$0xff] }
 0x155   : > { %v789_v23 = vpop.f32.mrf.mxu0  ;;  %v1014_v26 = vpop.f32.mrf.mxu1 }
 0x156   : > { %v3872_v24 = vadd.f32 %v1012_v16, %v788_v18  ;;  %v2248_v16 = vld [vmem:[%s2960_s13 + $0x92] sm:$0xff] }
 0x157   : > { %v792_v33 = vpop.f32.mrf.mxu0  ;;  %v1017_v36 = vpop.f32.mrf.mxu1  ;;  %2361 = vmatmul.mubr.f32.vlgmr.msra.gmra.mxu0 %v2241_v14  ;;  %2385 = vmatmul.mubr.f32.vlgmr.msra.gmra.mxu1 %v2257_v21  ;;  %v2512_v23 = vld [vmem:[%s2960_s13 + $0xf9] sm:$0xff] }
 0x158   : > { %v793_v43 = vadd.f32 %v2509_v37, %v792_v33  ;;  %2363 = vmatprep.mubr.f32.mxu0 %v2242_v31  ;;  %2387 = vmatprep.mubr.f32.mxu1 %v2258_v32  ;;  %v2249_v31 = vld [vmem:[%s2960_s13 + $0x9a] sm:$0xff]  ;;  %v2250_v37 = vld [vmem:[%s2960_s13 + $0xaa] sm:$0xff] }
 0x159   : > { %v794_v47 = vpop.f32.mrf.mxu0  ;;  %v1019_v48 = vpop.f32.mrf.mxu1  ;;  %v2265_v32 = vld [vmem:[%s2960_s13 + $0x15a] sm:$0xff] }
 0x15a   : > { %v3879_v58 = vadd.f32 %v1017_v36, %v793_v43  ;;  %v2266_v43 = vld [vmem:[%s2960_s13 + $0x16a] sm:$0xff] }
 0x15b   : > { %v797_v62 = vpop.f32.mrf.mxu0  ;;  %v1022_v63 = vpop.f32.mrf.mxu1  ;;  %2364 = vmatmul.mubr.f32.gmra.mxu0 %v2243_v46  ;;  %2388 = vmatmul.mubr.f32.gmra.mxu1 %v2259_v7  ;;  %v2513_v48 = vld [vmem:[%s2960_s13 + $0x109] sm:$0xff] }
 0x15c   : > { %v798_v5 = vadd.f32 %v2510_v3, %v797_v62  ;;  %2366 = vmatprep.mubr.f32.mxu0 %v2244_v49  ;;  %2390 = vmatprep.mubr.f32.mxu1 %v2260_v53  ;;  %v2251_v53 = vld [vmem:[%s2960_s13 + $0xb2] sm:$0xff] }
 0x15d   : > { %v799_v10 = vpop.f32.mrf.mxu0  ;;  %v1024_v19 = vpop.f32.mrf.mxu1  ;;  %v2267_v62 = vld [vmem:[%s2960_s13 + $0x172] sm:$0xff] }
 0x15e   : > { %v3886_v44 = vadd.f32 %v1022_v63, %v798_v5  ;;  %v2252_v5 = vld [vmem:[%s2960_s13 + $0xc2] sm:$0xff]  ;;  %v2514_v19 = vld [vmem:[%s2960_s13 + $0x111] sm:$0xff] }
 0x15f   : > { %v802_v54 = vpop.f32.mrf.mxu0  ;;  %v1027_v55 = vpop.f32.mrf.mxu1  ;;  %2367 = vmatmul.mubr.f32.gmra.mxu0 %v2245_v0  ;;  %2391 = vmatmul.mubr.f32.gmra.mxu1 %v2261_v9 }
 0x160   : > { %v803_v25 = vadd.f32 %v2511_v6, %v802_v54  ;;  %2369 = vmatprep.mubr.f32.mxu0 %v2246_v29  ;;  %2393 = vmatprep.mubr.f32.mxu1 %v2262_v40  ;;  %v2253_v40 = vld [vmem:[%s2960_s13 + $0xca] sm:$0xff]  ;;  %v2254_v6 = vld [vmem:[%s2960_s13 + $0xda] sm:$0xff] }
 0x161   : > { %v804_v59 = vpop.f32.mrf.mxu0  ;;  %v1029_v12 = vpop.f32.mrf.mxu1 }
 0x162   : > { %v3893_v18 = vadd.f32 %v1027_v55, %v803_v25  ;;  %v2270_v25 = vld [vmem:[%s2960_s13 + $0x19a] sm:$0xff] }
 0x163   : > { %v807_v14 = vpop.f32.mrf.mxu0  ;;  %v1032_v21 = vpop.f32.mrf.mxu1  ;;  %2370 = vmatmul.mubr.f32.gmra.mxu0 %v2247_v39  ;;  %2394 = vmatmul.mubr.f32.gmra.mxu1 %v2263_v35  ;;  %v2515_v12 = vld [vmem:[%s2960_s13 + $0x121] sm:$0xff] }
 0x164   : > { %v808_v26 = vadd.f32 %v2512_v23, %v807_v14  ;;  %2372 = vmatprep.mubr.f32.mxu0 %v2248_v16  ;;  %2396 = vmatprep.mubr.f32.mxu1 %v2264_v17  ;;  %v2255_v17 = vld [vmem:[%s2960_s13 + $0xe2] sm:$0xff] }
 0x165   : > { %v809_v33 = vpop.f32.mrf.mxu0  ;;  %v1034_v36 = vpop.f32.mrf.mxu1 }
 0x166   : > { %v3900_v46 = vadd.f32 %v1032_v21, %v808_v26 }
 0x167   : > { %v812_v7 = vpop.f32.mrf.mxu0  ;;  %v1037_v47 = vpop.f32.mrf.mxu1  ;;  %2373 = vmatmul.mubr.f32.gmra.mxu0 %v2249_v31  ;;  %2397 = vmatmul.mubr.f32.gmra.mxu1 %v2265_v32  ;;  %v2516_v32 = vld [vmem:[%s2960_s13 + $0x129] sm:$0xff] }
 0x168   : > { %v813_v49 = vadd.f32 %v2513_v48, %v812_v7  ;;  %2375 = vmatprep.mubr.f32.mxu0 %v2250_v37  ;;  %2399 = vmatprep.mubr.f32.mxu1 %v2266_v43 }
 0x169   : > { %v814_v63 = vpop.f32.mrf.mxu0  ;;  %v1039_v3 = vpop.f32.mrf.mxu1 }
 0x16a   : > { %v3906_v0 = vadd.f32 %v1037_v47, %v813_v49  ;;  %v2517_v47 = vld [vmem:[%s2960_s13 + $0x139] sm:$0xff] }
 0x16b   : > { %v817_v9 = vpop.f32.mrf.mxu0  ;;  %v1042_v10 = vpop.f32.mrf.mxu1  ;;  %2376 = vmatmul.mubr.f32.gmra.mxu0 %v2251_v53  ;;  %2400 = vmatmul.mubr.f32.gmra.mxu1 %v2267_v62 }
 0x16c   : > { %v818_v29 = vadd.f32 %v2514_v19, %v817_v9  ;;  %2378 = vmatprep.mubr.f32.mxu0 %v2252_v5  ;;  %2402 = vmatprep.mubr.f32.mxu1 %v3842_v56  ;;  %v2271_v56 = vld [vmem:[%s2960_s13 + $0x1a2] sm:$0xff]  ;;  %s4048_s13 = sand.u32 1, %s2626_s16  }
 0x16d   : > { %v819_v54 = vpop.f32.mrf.mxu0  ;;  %v1044_v55 = vpop.f32.mrf.mxu1  ;;  %s2078_s27 = sshll.u32 %s4048_s13, 8  ;;  %s1912_s8 = scalar_lea.sflag [#allocation3], %s4048_s13 }
 0x16e   : > { %v3913_v39 = vadd.f32 %v1042_v10, %v818_v29  ;;  %s4061_s28 = scalar_lea.vmem [#allocation2], %s2078_s27 }
 0x16f   : > { %v822_v35 = vpop.f32.mrf.mxu0  ;;  %v1047_v59 = vpop.f32.mrf.mxu1  ;;  %2379 = vmatmul.mubr.f32.gmra.mxu0 %v2253_v40  ;;  %2403 = vmatmul.mubr.f32.gmra.mxu1 %v3853_v20  ;;  %s1933_s30 = sshll.u32 %s4061_s28, 4  ;;  %s4195_s30 = int_to_ptr.vmem [resolvable:$true] %s1933_s30 }
 0x170   : > { %v823_v16 = vadd.f32 %v2515_v12, %v822_v35  ;;  %2381 = vmatprep.mubr.f32.mxu0 %v2254_v6  ;;  %2405 = vmatprep.mubr.f32.mxu1 %v2270_v25  ;;  %s2518_s9 = scalar_lea.vmem %s4195_s30, 4096  ;;  %p2525_p0 = scmp.lt.s32.totalorder %s4195_s30, %s2523_s11 }
 0x171   : > { %v824_v14 = vpop.f32.mrf.mxu0  ;;  %v1049_v21 = vpop.f32.mrf.mxu1  ;;  %p2519_p11 = scmp.ne.s32.totalorder %s4195_s30, %s2518_s9  ;;  %p2526_p1 = scmp.lt.s32.totalorder %s2524_s12, %s2518_s9 }
 0x172   : > { %v3919_v23 = vadd.f32 %v1047_v59, %v823_v16 }
 0x173   : > { %v827_v26 = vpop.f32.mrf.mxu0  ;;  %v1052_v31 = vpop.f32.mrf.mxu1  ;;  %2382 = vmatmul.mubr.f32.gmra.mxu0 %v2255_v17  ;;  %2406 = vmatmul.mubr.f32.gmra.mxu1 %v2271_v56  ;;  %p2520_p12 = pnand %p2519_p11, %p2707_p5  ;;  %p2527_p2 = por %p2526_p1, %p2525_p0 }
 0x174   : > { %v828_v33 = vadd.f32 %v2516_v32, %v827_v26 }
 0x175   : > { %v829_v36 = vpop.f32.mrf.mxu0  ;;  %v1054_v37 = vpop.f32.mrf.mxu1  ;;  %p2521_p13 = pneg %p2520_p12 }
 0x176   : > { %v3922_v20 = vadd.f32 %v1052_v31, %v828_v33 }
 0x177   : > { %v832_v43 = vpop.f32.mrf.mxu0  ;;  %v1057_v7 = vpop.f32.mrf.mxu1  ;;  %p2528_p3 = pnand %p2527_p2, %p2521_p13 }
 0x178   : > { %v833_v48 = vadd.f32 %v2517_v47, %v832_v43 }
 0x179   : > { %v834_v49 = vpop.f32.mrf.mxu0  ;;  %v1059_v53 = vpop.f32.mrf.mxu1 }
 0x17a   : > { %v3925_v62 = vadd.f32 %v1057_v7, %v833_v48 }
 0x17b   : > { %v837_v63 = vpop.f32.mrf.mxu0  ;;  %v1062_v3 = vpop.f32.mrf.mxu1 }
 0x17c   : > { %v838_v5 = vadd.f32 %v837_v63, %v4461_v52 }
 0x17d   : > { %v839_v9 = vpop.f32.mrf.mxu0  ;;  %v1064_v10 = vpop.f32.mrf.mxu1 }
 0x17e   : > { %v3928_v19 = vadd.f32 %v1062_v3, %v838_v5 }
 0x17f   : > { %v842_v29 = vpop.f32.mrf.mxu0  ;;  %v1067_v40 = vpop.f32.mrf.mxu1 }
 0x180   : > { %v843_v54 = vadd.f32 %v842_v29, %v4464_v8 }
 0x181   : > { %v844_v55 = vpop.f32.mrf.mxu0  ;;  %v1069_v6 = vpop.f32.mrf.mxu1 }
 0x182   : > { %v3931_v25 = vadd.f32 %v1067_v40, %v843_v54 }
 0x183   : > { %v847_v35 = vpop.f32.mrf.mxu0  ;;  %v1072_v59 = vpop.f32.mrf.mxu1 }
 0x184   : > { %v848_v12 = vadd.f32 %v847_v35, %v4467_v45 }
 0x185   : > { %v849_v16 = vpop.f32.mrf.mxu0  ;;  %v1074_v17 = vpop.f32.mrf.mxu1 }
 0x186   : > { %v3934_v56 = vadd.f32 %v1072_v59, %v848_v12 }
 0x187   : > { %v852_v52 = vpop.f32.mrf.mxu0  ;;  %v1077_v14 = vpop.f32.mrf.mxu1 }
 0x188   : > { %v853_v21 = vadd.f32 %v852_v52, %v3581_v11 }
 0x189   : > { %v854_v26 = vpop.f32.mrf.mxu0  ;;  %v1079_v31 = vpop.f32.mrf.mxu1 }
 0x18a   : > { %v3937_v32 = vadd.f32 %v1077_v14, %v853_v21 }
 0x18b   : > { %v857_v8 = vpop.f32.mrf.mxu0  ;;  %v1082_v33 = vpop.f32.mrf.mxu1 }
 0x18c   : > { %v858_v36 = vadd.f32 %v857_v8, %v3602_v60 }
 0x18d   : > { %v859_v37 = vpop.f32.mrf.mxu0  ;;  %v1084_v43 = vpop.f32.mrf.mxu1 }
 0x18e   : > { %v3940_v7 = vadd.f32 %v1082_v33, %v858_v36 }
 0x18f   : > { %v862_v45 = vpop.f32.mrf.mxu0  ;;  %v1087_v47 = vpop.f32.mrf.mxu1 }
 0x190   : > { %v863_v48 = vadd.f32 %v3822_v27, %v862_v45 }
 0x191   : > { %v864_v49 = vpop.f32.mrf.mxu0  ;;  %v1089_v53 = vpop.f32.mrf.mxu1 }
 0x192   : > { %v3943_v63 = vadd.f32 %v1087_v47, %v863_v48 }
 0x193   : > { %v867_v11 = vpop.f32.mrf.mxu0  ;;  %v1092_v3 = vpop.f32.mrf.mxu1 }
 0x194   : > { %4472 = vst [vmem:[#allocation9_spill] sm:$0xff] %v3943_v63  ;;  %v868_v5 = vadd.f32 %v3832_v41, %v867_v11 }
 0x195   : > { %v869_v9 = vpop.f32.mrf.mxu0  ;;  %v1094_v10 = vpop.f32.mrf.mxu1 }
 0x196   : > { %v3946_v29 = vadd.f32 %v1092_v3, %v868_v5 }
 0x197   : > { %v1162_v60 = vpop.f32.mrf.mxu0  ;;  %v1387_v40 = vpop.f32.mrf.mxu1 }
 0x198   : > { %4473 = vst [vmem:[#allocation11_spill] sm:$0xff] %v3946_v29  ;;  %v1163_v54 = vadd.f32 %v1162_v60, %v3751_v51 }
 0x199   : > { %v1164_v55 = vpop.f32.mrf.mxu0  ;;  %v1389_v6 = vpop.f32.mrf.mxu1 }
 0x19a   : > { %v3949_v35 = vadd.f32 %v1387_v40, %v1163_v54 }
 0x19b   : > { %v1167_v27 = vpop.f32.mrf.mxu0  ;;  %v1392_v59 = vpop.f32.mrf.mxu1 }
 0x19c   : > { %v1168_v12 = vadd.f32 %v1167_v27, %v3758_v4 }
 0x19d   : > { %v1169_v16 = vpop.f32.mrf.mxu0  ;;  %v1394_v17 = vpop.f32.mrf.mxu1 }
 0x19e   : > { %v3952_v52 = vadd.f32 %v1392_v59, %v1168_v12 }
 0x19f   : > { %v1172_v41 = vpop.f32.mrf.mxu0  ;;  %v1397_v14 = vpop.f32.mrf.mxu1 }
 0x1a0   : > { %v1173_v21 = vadd.f32 %v1172_v41, %v3765_v34 }
 0x1a1   : > { %v1174_v26 = vpop.f32.mrf.mxu0  ;;  %v1399_v31 = vpop.f32.mrf.mxu1 }
 0x1a2   : > { %v3955_v8 = vadd.f32 %v1397_v14, %v1173_v21 }
 0x1a3   : > { %v1177_v51 = vpop.f32.mrf.mxu0  ;;  %v1402_v33 = vpop.f32.mrf.mxu1 }
 0x1a4   : > { %v1178_v36 = vadd.f32 %v1177_v51, %v3772_v50 }
 0x1a5   : > { %v1179_v37 = vpop.f32.mrf.mxu0  ;;  %v1404_v43 = vpop.f32.mrf.mxu1 }
 0x1a6   : > { %v3958_v45 = vadd.f32 %v1402_v33, %v1178_v36 }
 0x1a7   : > { %v1182_v4 = vpop.f32.mrf.mxu0  ;;  %v1407_v47 = vpop.f32.mrf.mxu1 }
 0x1a8   : > { %v1183_v48 = vadd.f32 %v1182_v4, %v3779_v22 }
 0x1a9   : > { %v1184_v49 = vpop.f32.mrf.mxu0  ;;  %v1409_v53 = vpop.f32.mrf.mxu1 }
 0x1aa   : > { %v3961_v11 = vadd.f32 %v1407_v47, %v1183_v48 }
 0x1ab   : > { %v1187_v34 = vpop.f32.mrf.mxu0  ;;  %v1412_v3 = vpop.f32.mrf.mxu1 }
 0x1ac   : > { %v1188_v5 = vadd.f32 %v1187_v34, %v3786_v38 }
 0x1ad   : > { %v1189_v9 = vpop.f32.mrf.mxu0  ;;  %v1414_v10 = vpop.f32.mrf.mxu1 }
 0x1ae   : > { %v3964_v60 = vadd.f32 %v1412_v3, %v1188_v5 }
 0x1af   : > { %v1192_v50 = vpop.f32.mrf.mxu0  ;;  %v1417_v40 = vpop.f32.mrf.mxu1 }
 0x1b0   : > { %v1193_v54 = vadd.f32 %v1192_v50, %v3793_v57 }
 0x1b1   : > { %v1194_v55 = vpop.f32.mrf.mxu0  ;;  %v1419_v6 = vpop.f32.mrf.mxu1 }
 0x1b2   : > { %v3967_v27 = vadd.f32 %v1417_v40, %v1193_v54 }
 0x1b3   : > { %v1197_v22 = vpop.f32.mrf.mxu0  ;;  %v1422_v59 = vpop.f32.mrf.mxu1 }
 0x1b4   : > { %v1198_v12 = vadd.f32 %v1197_v22, %v3800_v15 }
 0x1b5   : > { %v1199_v16 = vpop.f32.mrf.mxu0  ;;  %v1424_v17 = vpop.f32.mrf.mxu1 }
 0x1b6   : > { %v3970_v41 = vadd.f32 %v1422_v59, %v1198_v12 }
 0x1b7   : > { %v1202_v38 = vpop.f32.mrf.mxu0  ;;  %v1427_v14 = vpop.f32.mrf.mxu1 }
 0x1b8   : > { %v1203_v21 = vadd.f32 %v1202_v38, %v3807_v1 }
 0x1b9   : > { %v1204_v26 = vpop.f32.mrf.mxu0  ;;  %v1429_v31 = vpop.f32.mrf.mxu1 }
 0x1ba   : > { %v3973_v51 = vadd.f32 %v1427_v14, %v1203_v21 }
 0x1bb   : > { %v1207_v57 = vpop.f32.mrf.mxu0  ;;  %v1432_v33 = vpop.f32.mrf.mxu1 }
 0x1bc   : > { %v1208_v36 = vadd.f32 %v1207_v57, %v3814_v13 }
 0x1bd   : > { %v1209_v37 = vpop.f32.mrf.mxu0  ;;  %v1434_v43 = vpop.f32.mrf.mxu1 }
 0x1be   : > { %v3976_v4 = vadd.f32 %v1432_v33, %v1208_v36 }
 0x1bf   : > { %v1212_v15 = vpop.f32.mrf.mxu0  ;;  %v1437_v47 = vpop.f32.mrf.mxu1 }
 0x1c0   : > { %v1213_v48 = vadd.f32 %v1212_v15, %v3824_v28 }
 0x1c1   : > { %v1214_v49 = vpop.f32.mrf.mxu0  ;;  %v1439_v53 = vpop.f32.mrf.mxu1 }
 0x1c2   : > { %v3979_v34 = vadd.f32 %v1437_v47, %v1213_v48 }
 0x1c3   : > { %v1217_v1 = vpop.f32.mrf.mxu0  ;;  %v1442_v3 = vpop.f32.mrf.mxu1 }
 0x1c4   : > { %v1218_v5 = vadd.f32 %v1217_v1, %v3834_v42 }
 0x1c5   : > { %v1219_v9 = vpop.f32.mrf.mxu0  ;;  %v1444_v10 = vpop.f32.mrf.mxu1 }
 0x1c6   : > { %v3982_v50 = vadd.f32 %v1442_v3, %v1218_v5 }
 0x1c7   : > { %v1222_v13 = vpop.f32.mrf.mxu0  ;;  %v1447_v40 = vpop.f32.mrf.mxu1 }
 0x1c8   : > { %v1223_v54 = vadd.f32 %v1222_v13, %v3845_v61 }
 0x1c9   : > { %v1224_v55 = vpop.f32.mrf.mxu0  ;;  %v1449_v6 = vpop.f32.mrf.mxu1 }
 0x1ca   : > { %v3985_v22 = vadd.f32 %v1447_v40, %v1223_v54 }
 0x1cb   : > { %v1227_v28 = vpop.f32.mrf.mxu0  ;;  %v1452_v59 = vpop.f32.mrf.mxu1 }
 0x1cc   : > { %4474 = vst [vmem:[#allocation14_spill] sm:$0xff] %v3985_v22  ;;  %v1228_v12 = vadd.f32 %v1227_v28, %v3856_v30 }
 0x1cd   : > { %v1229_v16 = vpop.f32.mrf.mxu0  ;;  %v1454_v17 = vpop.f32.mrf.mxu1 }
 0x1ce   : > { %v3988_v38 = vadd.f32 %v1452_v59, %v1228_v12 }
 0x1cf   : > { %v1232_v42 = vpop.f32.mrf.mxu0  ;;  %v1457_v14 = vpop.f32.mrf.mxu1 }
 0x1d0   : > { %4475 = vst [vmem:[#allocation10_spill] sm:$0xff] %v3988_v38  ;;  %v1233_v21 = vadd.f32 %v1232_v42, %v3864_v2 }
 0x1d1   : > { %v1234_v26 = vpop.f32.mrf.mxu0  ;;  %v1459_v31 = vpop.f32.mrf.mxu1 }
 0x1d2   : > { %v3991_v57 = vadd.f32 %v1457_v14, %v1233_v21 }
 0x1d3   : > { %v1237_v61 = vpop.f32.mrf.mxu0  ;;  %v1462_v33 = vpop.f32.mrf.mxu1 }
 0x1d4   : > { %4476 = vst [vmem:[#allocation13_spill] sm:$0xff] %v3991_v57  ;;  %v1238_v36 = vadd.f32 %v1237_v61, %v3872_v24 }
 0x1d5   : > { %v1239_v37 = vpop.f32.mrf.mxu0  ;;  %v1464_v43 = vpop.f32.mrf.mxu1 }
 0x1d6   : > { %v3994_v15 = vadd.f32 %v1462_v33, %v1238_v36 }
 0x1d7   : > { %v1242_v30 = vpop.f32.mrf.mxu0  ;;  %v1467_v47 = vpop.f32.mrf.mxu1 }
 0x1d8   : > { %4477 = vst [vmem:[#allocation17_spill] sm:$0xff] %v3994_v15  ;;  %v1243_v48 = vadd.f32 %v1242_v30, %v3879_v58 }
 0x1d9   : > { %v1244_v49 = vpop.f32.mrf.mxu0  ;;  %v1469_v53 = vpop.f32.mrf.mxu1 }
 0x1da   : > { %v3997_v1 = vadd.f32 %v1467_v47, %v1243_v48 }
 0x1db   : > { %v1247_v2 = vpop.f32.mrf.mxu0  ;;  %v1472_v3 = vpop.f32.mrf.mxu1 }
 0x1dd   : > { %v1249_v5 = vpop.f32.mrf.mxu0  ;;  %v1474_v9 = vpop.f32.mrf.mxu1 }
 0x1df   : > { %v1252_v10 = vpop.f32.mrf.mxu0  ;;  %v3999_v13 = vpop.f32.mrf.mxu1 }
 0x1e1   : > { %v1254_v24 = vpop.f32.mrf.mxu0  ;;  %v1479_v40 = vpop.f32.mrf.mxu1 }
 0x1e3   : > { %v1257_v54 = vpop.f32.mrf.mxu0  ;;  %v4001_v55 = vpop.f32.mrf.mxu1 }
 0x1e5   : > { %v1259_v6 = vpop.f32.mrf.mxu0  ;;  %v1484_v28 = vpop.f32.mrf.mxu1 }
 0x1e7   : > { %v4003_v59 = vpop.f32.mrf.mxu0  ;;  %v4005_v58 = vpop.f32.mrf.mxu1 }
 0x1e9   : > { %v1264_v12 = vpop.f32.mrf.mxu0  ;;  %v1489_v16 = vpop.f32.mrf.mxu1 }
 0x1eb   : > { %v4007_v17 = vpop.f32.mrf.mxu0  ;;  %v4009_v42 = vpop.f32.mrf.mxu1 }
 0x1ed   : > { %v1269_v14 = vpop.f32.mrf.mxu0  ;;  %v1494_v21 = vpop.f32.mrf.mxu1 }
 0x1ef   : > { %v4011_v26 = vpop.f32.mrf.mxu0  ;;  %v4013_v31 = vpop.f32.mrf.mxu1 }
 0x1f1   : > { %v1274_v61 = vpop.f32.mrf.mxu0  ;;  %v1499_v33 = vpop.f32.mrf.mxu1 }
 0x1f3   : > { %v4015_v36 = vpop.f32.mrf.mxu0  ;;  %v4017_v37 = vpop.f32.mrf.mxu1 }
 0x1f5   : > { %v1279_v43 = vpop.f32.mrf.mxu0  ;;  %v1504_v30 = vpop.f32.mrf.mxu1 }
 0x1f7   : > { %v4019_v47 = vpop.f32.mrf.mxu0  ;;  %v4021_v48 = vpop.f32.mrf.mxu1 }
 0x1f9   : > { %v1284_v49 = vpop.f32.mrf.mxu0  ;;  %v1509_v53 = vpop.f32.mrf.mxu1 }
 0x1fb   : > { %v4023_v5 = vpop.f32.mrf.mxu0  ;;  %v4025_v9 = vpop.f32.mrf.mxu1 }
 0x1fd   : > { %v1289_v24 = vpop.f32.mrf.mxu0  ;;  %v1514_v40 = vpop.f32.mrf.mxu1 }
 0x1ff   : > { %v4027_v6 = vpop.f32.mrf.mxu0  ;;  %v4029_v28 = vpop.f32.mrf.mxu1 }
 0x201   : > { %v1294_v12 = vpop.f32.mrf.mxu0  ;;  %v1519_v16 = vpop.f32.mrf.mxu1 }
 0x203   : > { %v4031_v14 = vpop.f32.mrf.mxu0  ;;  %v4033_v21 = vpop.f32.mrf.mxu1 }
 0x205   : > { %v1299_v61 = vpop.f32.mrf.mxu0  ;;  %v1524_v33 = vpop.f32.mrf.mxu1 }
 0x206   : > { %v1248_v61 = vadd.f32 %v1247_v2, %v3886_v44  ;;  %v1268_v2 = vadd.f32 %v4007_v17, %v3913_v39 }
 0x207   : > { %v4035_v43 = vpop.f32.mrf.mxu0  ;;  %v4037_v30 = vpop.f32.mrf.mxu1 }
 0x208   : > { %4478 = vst [vmem:[#allocation12_spill] sm:$0xff] %v4037_v30 }
 0x209   : > { %v1304_v49 = vpop.f32.mrf.mxu0  ;;  %v1529_v53 = vpop.f32.mrf.mxu1 }
 0x20b   : > { %v4039_v24 = vpop.f32.mrf.mxu0  ;;  %v4041_v40 = vpop.f32.mrf.mxu1 }
 0x20d   : > { %v1309_v57 = vpop.f32.mrf.mxu0  ;;  %v1534_v12 = vpop.f32.mrf.mxu1 }
 0x20e   : > { %v1473_v57 = vadd.f32 %v1472_v3, %v1248_v61  ;;  %v1253_v12 = vadd.f32 %v1252_v10, %v3893_v18 }
 0x20f   : > { %v4043_v16 = vpop.f32.mrf.mxu0  ;;  %v4045_v15 = vpop.f32.mrf.mxu1 }
 0x210   : > { %4479 = vst [vmem:[#allocation16_spill] sm:$0xff] %v4043_v16  ;;  %4480 = vst [vmem:[#allocation20_spill] sm:$0xff] %v4045_v15  ;;  %v1258_v16 = vadd.f32 %v1257_v54, %v3900_v46 }
 0x211   : > { %v1314_v22 = vpop.f32.mrf.mxu0  ;;  %v1539_v63 = vpop.f32.mrf.mxu1 }
 0x213   : > { %v4051_v33 = vpop.f32.mrf.mxu0  ;;  %v4053_v49 = vpop.f32.mrf.mxu1 }
 0x215   : > { %v1319_v53 = vpop.f32.mrf.mxu0  ;;  %v1544_v30 = vpop.f32.mrf.mxu1 }
 0x216   : > { %v1493_v53 = vadd.f32 %v4009_v42, %v1268_v2  ;;  %v1273_v42 = vadd.f32 %v4011_v26, %v3919_v23 }
 0x217   : > { %v2362_v15 = vpop.f32.mrf.mxu0  ;;  %v2386_v22 = vpop.f32.mrf.mxu1 }
 0x218   : > { %v1618_v63 = vadd.f32 %v2362_v15, %v3952_v52  ;;  %v4059_v38 = vadd.f32 %v2386_v22, %v1473_v57  ;;  %v1478_v52 = vadd.f32 %v3999_v13, %v1253_v12  ;;  %v1483_v15 = vadd.f32 %v4001_v55, %v1258_v16 }
 0x219   : > { %v1612_v29 = vpop.f32.mrf.mxu0  ;;  %v1692_v44 = vpop.f32.mrf.mxu1  ;;  %v1278_v57 = vadd.f32 %v4015_v36, %v3922_v20 }
 0x21a   : > { %1772 = vst [vmem:[%s4061_s28 + $0x8] sm:$0xff] %v1618_v63  ;;  %1788 = vst [vmem:[%s4061_s28 + $0x88] sm:$0xff] %v4059_v38  ;;  %v1613_v18 = vadd.f32 %v1612_v29, %v3949_v35  ;;  %v4068_v46 = vadd.f32 %v1692_v44, %v3997_v1  ;;  %v1842_v54 = vmul.f32 %v1618_v63, %v1618_v63 }
 0x21b   : > { %v2365_v3 = vpop.f32.mrf.mxu0  ;;  %v2389_v10 = vpop.f32.mrf.mxu1  ;;  %v1263_v35 = vadd.f32 %v4003_v59, %v3906_v0  ;;  %v1503_v2 = vadd.f32 %v4017_v37, %v1278_v57  ;;  %v1283_v37 = vadd.f32 %v4019_v47, %v3925_v62 }
 0x21c   : > { %1771 = vst [vmem:[%s4061_s28] sm:$0xff] %v1613_v18  ;;  %v1803_v30 = vadd.f32 %v1618_v63, %v1613_v18  ;;  %v1841_v61 = vmul.f32 %v1613_v18, %v1613_v18  ;;  %1787 = vst [vmem:[%s4061_s28 + $0x80] sm:$0xff] %v4068_v46  ;;  %v1628_v29 = vadd.f32 %v2365_v3, %v3958_v45 }
 0x21d   : > { %v4080_v1 = vadd.f32 %v2389_v10, %v1483_v15  ;;  %v1622_v13 = vpop.f32.mrf.mxu0  ;;  %v1702_v39 = vpop.f32.mrf.mxu1  ;;  %v1488_v22 = vadd.f32 %v4005_v58, %v1263_v35 }
 0x21e   : > { %v1873_v55 = vadd.f32 %v1842_v54, %v1841_v61  ;;  %1774 = vst [vmem:[%s4061_s28 + $0x18] sm:$0xff] %v1628_v29  ;;  %v1623_v17 = vadd.f32 %v1622_v13, %v3955_v8  ;;  %v4084_v16 = vadd.f32 %v1702_v39, %v1478_v52  ;;  %v1844_v44 = vmul.f32 %v1628_v29, %v1628_v29 }
 0x21f   : > { %1790 = vst [vmem:[%s4061_s28 + $0x98] sm:$0xff] %v4080_v1  ;;  %v2368_v0 = vpop.f32.mrf.mxu0  ;;  %v2392_v45 = vpop.f32.mrf.mxu1 }
 0x220   : > { %1773 = vst [vmem:[%s4061_s28 + $0x10] sm:$0xff] %v1623_v17  ;;  %v1804_v59 = vadd.f32 %v1803_v30, %v1623_v17  ;;  %v1843_v12 = vmul.f32 %v1623_v17, %v1623_v17  ;;  %1789 = vst [vmem:[%s4061_s28 + $0x90] sm:$0xff] %v4084_v16  ;;  %v1638_v8 = vadd.f32 %v2368_v0, %v3964_v60 }
 0x221   : > { %v4098_v20 = vadd.f32 %v2392_v45, %v1493_v53  ;;  %v1632_v36 = vpop.f32.mrf.mxu0  ;;  %v1712_v63 = vpop.f32.mrf.mxu1  ;;  %v1288_v60 = vadd.f32 %v4023_v5, %v3928_v19  ;;  %v1498_v30 = vadd.f32 %v4013_v31, %v1273_v42  ;;  %v1298_v31 = vadd.f32 %v4031_v14, %v3934_v56 }
 0x222   : > { %v1874_v18 = vadd.f32 %v1873_v55, %v1843_v12  ;;  %1776 = vst [vmem:[%s4061_s28 + $0x28] sm:$0xff] %v1638_v8  ;;  %v1633_v52 = vadd.f32 %v1632_v36, %v3961_v11  ;;  %v1805_v15 = vadd.f32 %v1804_v59, %v1628_v29  ;;  %v4107_v58 = vadd.f32 %v1712_v63, %v1488_v22 }
 0x223   : > { %1792 = vst [vmem:[%s4061_s28 + $0xa8] sm:$0xff] %v4098_v20  ;;  %v2371_v23 = vpop.f32.mrf.mxu0  ;;  %v2395_v26 = vpop.f32.mrf.mxu1  ;;  %v1846_v29 = vmul.f32 %v1638_v8, %v1638_v8  ;;  %v1508_v0 = vadd.f32 %v4021_v48, %v1283_v37  ;;  %v1308_v48 = vadd.f32 %v4039_v24, %v3940_v7  ;;  %v4483_v37 = vld [vmem:[#allocation12_spill] sm:$0xff] }
 0x224   : > { %1775 = vst [vmem:[%s4061_s28 + $0x20] sm:$0xff] %v1633_v52  ;;  %v1806_v3 = vadd.f32 %v1805_v15, %v1633_v52  ;;  %v1845_v10 = vmul.f32 %v1633_v52, %v1633_v52  ;;  %v1875_v54 = vadd.f32 %v1874_v18, %v1844_v44  ;;  %v1648_v11 = vadd.f32 %v2371_v23, %v3970_v41 }
 0x225   : > { %1791 = vst [vmem:[%s4061_s28 + $0xa0] sm:$0xff] %v4107_v58  ;;  %v4116_v19 = vadd.f32 %v2395_v26, %v1503_v2  ;;  %v1642_v5 = vpop.f32.mrf.mxu0  ;;  %v1722_v61 = vpop.f32.mrf.mxu1  ;;  %v1513_v41 = vadd.f32 %v4025_v9, %v1288_v60  ;;  %v1293_v9 = vadd.f32 %v4027_v6, %v3931_v25 }
 0x226   : > { %v1876_v35 = vadd.f32 %v1875_v54, %v1845_v10  ;;  %1778 = vst [vmem:[%s4061_s28 + $0x38] sm:$0xff] %v1648_v11  ;;  %v1643_v13 = vadd.f32 %v1642_v5, %v3967_v27  ;;  %v1807_v39 = vadd.f32 %v1806_v3, %v1638_v8  ;;  %v4125_v62 = vadd.f32 %v1722_v61, %v1498_v30  ;;  %v4482_v30 = vld [vmem:[#allocation10_spill] sm:$0xff]  ;;  %v4485_v61 = vld [vmem:[#allocation16_spill] sm:$0xff] }
 0x227   : > { %1794 = vst [vmem:[%s4061_s28 + $0xb8] sm:$0xff] %v4116_v19  ;;  %v2374_v47 = vpop.f32.mrf.mxu0  ;;  %v2398_v55 = vpop.f32.mrf.mxu1  ;;  %v1848_v59 = vmul.f32 %v1648_v11, %v1648_v11  ;;  %v1518_v18 = vadd.f32 %v4029_v28, %v1293_v9  ;;  %v4481_v28 = vld [vmem:[#allocation11_spill] sm:$0xff] }
 0x228   : > { %1777 = vst [vmem:[%s4061_s28 + $0x30] sm:$0xff] %v1643_v13  ;;  %v1808_v17 = vadd.f32 %v1807_v39, %v1643_v13  ;;  %v1847_v53 = vmul.f32 %v1643_v13, %v1643_v13  ;;  %v1877_v57 = vadd.f32 %v1876_v35, %v1846_v29  ;;  %v1658_v27 = vadd.f32 %v2374_v47, %v3976_v4 }
 0x229   : > { %1793 = vst [vmem:[%s4061_s28 + $0xb0] sm:$0xff] %v4125_v62  ;;  %v4134_v56 = vadd.f32 %v2398_v55, %v1513_v41  ;;  %v1652_v14 = vpop.f32.mrf.mxu0  ;;  %v1732_v45 = vpop.f32.mrf.mxu1  ;;  %v1523_v4 = vadd.f32 %v4033_v21, %v1298_v31  ;;  %v1303_v21 = vadd.f32 %v4035_v43, %v3937_v32  ;;  %v1318_v26 = vadd.f32 %v4051_v33, %v4481_v28  ;;  %v4486_v31 = vld [vmem:[#allocation14_spill] sm:$0xff] }
 0x22a   : > { %v1878_v12 = vadd.f32 %v1877_v57, %v1847_v53  ;;  %1780 = vst [vmem:[%s4061_s28 + $0x48] sm:$0xff] %v1658_v27  ;;  %v1653_v8 = vadd.f32 %v1652_v14, %v3973_v51  ;;  %v1809_v22 = vadd.f32 %v1808_v17, %v1648_v11  ;;  %v4143_v25 = vadd.f32 %v1732_v45, %v1508_v0  ;;  %v4487_v45 = vld [vmem:[#allocation17_spill] sm:$0xff] }
 0x22b   : > { %1796 = vst [vmem:[%s4061_s28 + $0xc8] sm:$0xff] %v4134_v56  ;;  %v2377_v6 = vpop.f32.mrf.mxu0  ;;  %v2401_v42 = vpop.f32.mrf.mxu1  ;;  %v1850_v15 = vmul.f32 %v1658_v27, %v1658_v27  ;;  %v1528_v5 = vadd.f32 %v4483_v37, %v1303_v21  ;;  %v1543_v17 = vadd.f32 %v4053_v49, %v1318_v26 }
 0x22c   : > { %1779 = vst [vmem:[%s4061_s28 + $0x40] sm:$0xff] %v1653_v8  ;;  %v1810_v36 = vadd.f32 %v1809_v22, %v1653_v8  ;;  %v1849_v63 = vmul.f32 %v1653_v8, %v1653_v8  ;;  %v1879_v44 = vadd.f32 %v1878_v12, %v1848_v59  ;;  %v1668_v51 = vadd.f32 %v2377_v6, %v3982_v50  ;;  %v4488_v12 = vld [vmem:[#allocation20_spill] sm:$0xff] }
 0x22d   : > { %1795 = vst [vmem:[%s4061_s28 + $0xc0] sm:$0xff] %v4143_v25  ;;  %v4152_v7 = vadd.f32 %v2401_v42, %v1523_v4  ;;  %v1662_v24 = vpop.f32.mrf.mxu0  ;;  %v1742_v52 = vpop.f32.mrf.mxu1  ;;  %v1533_v50 = vadd.f32 %v4041_v40, %v1308_v48  ;;  %v4484_v40 = vld [vmem:[#allocation9_spill] sm:$0xff] }
 0x22e   : > { %v1880_v2 = vadd.f32 %v1879_v44, %v1849_v63  ;;  %1782 = vst [vmem:[%s4061_s28 + $0x58] sm:$0xff] %v1668_v51  ;;  %v1663_v60 = vadd.f32 %v1662_v24, %v3979_v34  ;;  %v1811_v23 = vadd.f32 %v1810_v36, %v1658_v27  ;;  %v4161_v32 = vadd.f32 %v1742_v52, %v1518_v18  ;;  %v4489_v42 = vld [vmem:[#allocation13_spill] sm:$0xff] }
 0x22f   : > { %1798 = vst [vmem:[%s4061_s28 + $0xd8] sm:$0xff] %v4152_v7  ;;  %v2380_v43 = vpop.f32.mrf.mxu0  ;;  %v2404_v3 = vpop.f32.mrf.mxu1  ;;  %v1313_v33 = vadd.f32 %v4485_v61, %v4484_v40  ;;  %v1852_v39 = vmul.f32 %v1668_v51, %v1668_v51 }
 0x230   : > { %1781 = vst [vmem:[%s4061_s28 + $0x50] sm:$0xff] %v1663_v60  ;;  %v1812_v10 = vadd.f32 %v1811_v23, %v1663_v60  ;;  %v1851_v54 = vmul.f32 %v1663_v60, %v1663_v60  ;;  %v1881_v11 = vadd.f32 %v1880_v2, %v1850_v15  ;;  %v1678_v34 = vadd.f32 %v2380_v43, %v4482_v30 }
 0x231   : > { %1797 = vst [vmem:[%s4061_s28 + $0xd0] sm:$0xff] %v4161_v32  ;;  %v4170_v29 = vadd.f32 %v2404_v3, %v1533_v50  ;;  %v1672_v35 = vpop.f32.mrf.mxu0  ;;  %v1752_v13 = vpop.f32.mrf.mxu1  ;;  %v1538_v8 = vadd.f32 %v4488_v12, %v1313_v33 }
 0x232   : > { %v1882_v41 = vadd.f32 %v1881_v11, %v1851_v54  ;;  %1784 = vst [vmem:[%s4061_s28 + $0x68] sm:$0xff] %v1678_v34  ;;  %v1673_v47 = vadd.f32 %v1672_v35, %v4486_v31  ;;  %v1813_v55 = vadd.f32 %v1812_v10, %v1668_v51  ;;  %v4177_v53 = vadd.f32 %v1752_v13, %v1528_v5 }
 0x233   : > { %1800 = vst [vmem:[%s4061_s28 + $0xe8] sm:$0xff] %v4170_v29  ;;  %v2383_v57 = vpop.f32.mrf.mxu0  ;;  %v2407_v27 = vpop.f32.mrf.mxu1  ;;  %v1854_v48 = vmul.f32 %v1678_v34, %v1678_v34 }
 0x234   : > { %1783 = vst [vmem:[%s4061_s28 + $0x60] sm:$0xff] %v1673_v47  ;;  %v1814_v0 = vadd.f32 %v1813_v55, %v1673_v47  ;;  %v1853_v9 = vmul.f32 %v1673_v47, %v1673_v47  ;;  %v1883_v14 = vadd.f32 %v1882_v41, %v1852_v39  ;;  %v1688_v59 = vadd.f32 %v2383_v57, %v4487_v45 }
 0x235   : > { %1799 = vst [vmem:[%s4061_s28 + $0xe0] sm:$0xff] %v4177_v53  ;;  %v4186_v49 = vadd.f32 %v2407_v27, %v1543_v17  ;;  %v1682_v22 = vpop.f32.mrf.mxu0  ;;  %v1762_v4 = vpop.f32.mrf.mxu1 }
 0x236   : > { %v1884_v6 = vadd.f32 %v1883_v14, %v1853_v9  ;;  %1786 = vst [vmem:[%s4061_s28 + $0x78] sm:$0xff] %v1688_v59  ;;  %v1683_v36 = vadd.f32 %v1682_v22, %v4489_v42  ;;  %v1815_v63 = vadd.f32 %v1814_v0, %v1678_v34  ;;  %v4199_v44 = vadd.f32 %v1762_v4, %v1538_v8 }
 0x237   : > { %1802 = vst [vmem:[%s4061_s28 + $0xf8] sm:$0xff] %v4186_v49  ;;  %v1856_v24 = vmul.f32 %v1688_v59, %v1688_v59 }
 0x238   : > { %1785 = vst [vmem:[%s4061_s28 + $0x70] sm:$0xff] %v1683_v36  ;;  %v1816_v51 = vadd.f32 %v1815_v63, %v1683_v36  ;;  %v1855_v18 = vmul.f32 %v1683_v36, %v1683_v36  ;;  %v1885_v21 = vadd.f32 %v1884_v6, %v1854_v48  ;;  %1801 = vst [vmem:[%s4061_s28 + $0xf0] sm:$0xff] %v4199_v44 }
 0x23a   : > { %v1817_v52 = vadd.f32 %v1816_v51, %v1688_v59  ;;  %v1886_v15 = vadd.f32 %v1885_v21, %v1855_v18 }
 0x23b   : > { %2531 = shalt.err (!%p2528_p3)
}
 0x23c   : > { %s2532_s14 = scalar_lea.hbm %s4193_s7, 4096  ;;  %s2536_s27 = scalar_lea.hbm %s4362_s2, 8192 }
 0x23d   : > { %p2533_p4 = scmp.ne.s32.totalorder %s4193_s7, %s2532_s14  ;;  %p2537_p9 = scmp.lt.s32.totalorder %s4193_s7, %s4362_s2 }
 0x23e   : > { %p2538_p10 = scmp.lt.s32.totalorder %s2536_s27, %s2532_s14 }
 0x23f   : > { %p2534_p7 = pnand %p2533_p4, %p2707_p5 }
 0x240   : > { %p2539_p11 = por %p2538_p10, %p2537_p9 }
 0x241   : > { %p2535_p8 = pneg %p2534_p7 }
 0x243   : > { %p2540_p12 = pnand %p2539_p11, %p2535_p8 }
 0x245   : > { %2543 = shalt.err (!%p2540_p12)
}
 0x246   : > { %s2638_s5 = smov 128   ;;  %s2639_s6 = smov 8   ;;  %v1857_v2 = vmul.f32 %v4068_v46, %v4068_v46  ;;  %v1818_v60 = vadd.f32 %v1817_v52, %v4068_v46  ;;  %v1887_v23 = vadd.f32 %v1886_v15, %v1856_v24  ;;  %v1858_v50 = vmul.f32 %v4059_v38, %v4059_v38 }
 0x247   : > { %2441 = dma.vmem_to_hbm [thread:$0]  (%p2707_p5), %s4195_s30, 4096, %s4193_s7, %s1912_s8, %s2638_s5, %s2638_s5, %s2639_s6   ;;  %v1859_v43 = vmul.f32 %v4084_v16, %v4084_v16  ;;  %v1860_v54 = vmul.f32 %v4080_v1, %v4080_v1  ;;  %v1861_v46 = vmul.f32 %v4107_v58, %v4107_v58  ;;  %v1872_v12 = vmul.f32 %v4186_v49, %v4186_v49 }
 0x248   : > { %v1819_v28 = vadd.f32 %v1818_v60, %v4059_v38  ;;  %v1888_v26 = vadd.f32 %v1887_v23, %v1857_v2  ;;  %v1862_v38 = vmul.f32 %v4098_v20, %v4098_v20  ;;  %s1916_s30 = sand.u32 1, %s2688_s19   ;;  %s2275_s7 = sshll.u32 %s2688_s19, 4 }
 0x249   : > { %s200_s8 = scalar_lea.vmem [#allocation4], %s4048_s13  ;;  %s206_s10 = scalar_lea.vmem [#allocation6], %s4048_s13 }
 0x24a   : > { %v1820_v3 = vadd.f32 %v1819_v28, %v4084_v16  ;;  %v1889_v10 = vadd.f32 %v1888_v26, %v1858_v50  ;;  %v1863_v16 = vmul.f32 %v4125_v62, %v4125_v62  ;;  %s1949_s9 = sshll.u32 %s200_s8, 4  ;;  %s1962_s11 = sshll.u32 %s206_s10, 4  ;;  %s4286_s9 = int_to_ptr.vmem [resolvable:$true] %s1949_s9  ;;  %s4293_s11 = int_to_ptr.vmem [resolvable:$true] %s1962_s11 }
 0x24b   : > { %s4284_s22 = scalar_lea.hbm %s4363_s3, %s2275_s7  ;;  %s4291_s27 = scalar_lea.hbm %s4364_s4, %s2275_s7 }
 0x24c   : > { %v1821_v11 = vadd.f32 %v1820_v3, %v4080_v1  ;;  %v1890_v30 = vadd.f32 %v1889_v10, %v1859_v43  ;;  %v1864_v1 = vmul.f32 %v4116_v19, %v4116_v19  ;;  %s4295_s28 = scalar_lea.sflag [#allocation5], %s1916_s30  ;;  %s2544_s29 = scalar_lea.vmem %s4286_s9, 16 }
 0x24d   : > { %p2545_p13 = scmp.ne.s32.totalorder %s4286_s9, %s2544_s29  ;;  %s2640_s5 = smov [#allocation4]  }
 0x24e   : > { %v1822_v34 = vadd.f32 %v1821_v11, %v4107_v58  ;;  %v1891_v37 = vadd.f32 %v1890_v30, %v1860_v54  ;;  %v1865_v58 = vmul.f32 %v4143_v25, %v4143_v25  ;;  %s2548_s6 = sshll.u32 %s2640_s5, 4  ;;  %s2549_s6 = int_to_ptr.vmem [resolvable:$false] %s2548_s6 }
 0x24f   : > { %p2546_p0 = pnand %p2545_p13, %p2707_p5  ;;  %s2550_s12 = scalar_lea.vmem %s2549_s6, 32 }
 0x250   : > { %v1823_v5 = vadd.f32 %v1822_v34, %v4098_v20  ;;  %v1892_v40 = vadd.f32 %v1891_v37, %v1861_v46  ;;  %v1866_v20 = vmul.f32 %v4134_v56, %v4134_v56  ;;  %p2551_p2 = scmp.lt.s32.totalorder %s4286_s9, %s2549_s6  ;;  %p2552_p3 = scmp.lt.s32.totalorder %s2550_s12, %s2544_s29 }
 0x251   : > { %p2547_p1 = pneg %p2546_p0 }
 0x252   : > { %v1893_v61 = vadd.f32 %v1892_v40, %v1862_v38  ;;  %v1824_v33 = vadd.f32 %v1823_v5, %v4125_v62  ;;  %v1867_v62 = vmul.f32 %v4161_v32, %v4161_v32  ;;  %p2553_p4 = por %p2552_p3, %p2551_p2 }
 0x254   : > { %v1825_v35 = vadd.f32 %v1824_v33, %v4116_v19  ;;  %v1894_v13 = vadd.f32 %v1893_v61, %v1863_v16  ;;  %v1868_v19 = vmul.f32 %v4152_v7, %v4152_v7  ;;  %p2554_p7 = pnand %p2553_p4, %p2547_p1 }
 0x256   : > { %v1826_v39 = vadd.f32 %v1825_v35, %v4143_v25  ;;  %v1895_v41 = vadd.f32 %v1894_v13, %v1864_v1  ;;  %v1869_v25 = vmul.f32 %v4177_v53, %v4177_v53 }
 0x258   : > { %v1827_v31 = vadd.f32 %v1826_v39, %v4134_v56  ;;  %v1896_v47 = vadd.f32 %v1895_v41, %v1865_v58  ;;  %v1870_v56 = vmul.f32 %v4170_v29, %v4170_v29 }
 0x25a   : > { %v1828_v55 = vadd.f32 %v1827_v31, %v4161_v32  ;;  %v1897_v17 = vadd.f32 %v1896_v47, %v1866_v20 }
 0x25c   : > { %v1829_v57 = vadd.f32 %v1828_v55, %v4152_v7  ;;  %v1898_v27 = vadd.f32 %v1897_v17, %v1867_v62  ;;  %v1871_v7 = vmul.f32 %v4199_v44, %v4199_v44 }
 0x25e   : > { %v1830_v0 = vadd.f32 %v1829_v57, %v4177_v53  ;;  %v1899_v9 = vadd.f32 %v1898_v27, %v1868_v19 }
 0x260   : > { %v1831_v14 = vadd.f32 %v1830_v0, %v4170_v29  ;;  %v1900_v32 = vadd.f32 %v1899_v9, %v1869_v25 }
 0x262   : > { %v1832_v45 = vadd.f32 %v1831_v14, %v4199_v44  ;;  %v1901_v59 = vadd.f32 %v1900_v32, %v1870_v56 }
 0x264   : > { %v1833_v53 = vadd.f32 %v1832_v45, %v4186_v49  ;;  %v1902_v8 = vadd.f32 %v1901_v59, %v1871_v7 }
 0x266   : > { %v1834_v22 = vrot.slane %v1833_v53, 4  ;;  %v1903_v4 = vadd.f32 %v1902_v8, %v1872_v12 }
 0x268   : > { %v1835_v29 = vadd.f32 %v1834_v22, %v1833_v53  ;;  %v1904_v48 = vrot.slane %v1903_v4, 4 }
 0x26a   : > { %v1905_v6 = vadd.f32 %v1904_v48, %v1903_v4  ;;  %v1836_v42 = vrot.slane %v1835_v29, 2 }
 0x26c   : > { %v1837_v36 = vadd.f32 %v1836_v42, %v1835_v29  ;;  %v1906_v63 = vrot.slane %v1905_v6, 2 }
 0x26e   : > { %v1838_v44 = vrot.slane %v1837_v36, 1  ;;  %v1907_v51 = vadd.f32 %v1906_v63, %v1905_v6 }
 0x270   : > { %v1839_v49 = vadd.f32 %v1838_v44, %v1837_v36  ;;  %v1908_v18 = vrot.slane %v1907_v51, 1 }
 0x272   : > { %1840 = vst [vmem:[%s200_s8] sm:$0x1] %v1839_v49  ;;  %v1909_v21 = vadd.f32 %v1908_v18, %v1907_v51 }
 0x273   : > { %2557 = shalt.err (!%p2554_p7)
}
 0x274   : > { %s2558_s30 = scalar_lea.hbm %s4284_s22, 16  ;;  %s2562_s14 = scalar_lea.hbm %s4363_s3, 32 }
 0x275   : > { %p2559_p8 = scmp.ne.s32.totalorder %s4284_s22, %s2558_s30  ;;  %p2563_p11 = scmp.lt.s32.totalorder %s4284_s22, %s4363_s3 }
 0x276   : > { %p2564_p12 = scmp.lt.s32.totalorder %s2562_s14, %s2558_s30 }
 0x277   : > { %p2560_p9 = pnand %p2559_p8, %p2707_p5 }
 0x278   : > { %p2565_p13 = por %p2564_p12, %p2563_p11 }
 0x279   : > { %p2561_p10 = pneg %p2560_p9 }
 0x27b   : > { %p2566_p0 = pnand %p2565_p13, %p2561_p10 }
 0x27d   : > { %2569 = shalt.err (!%p2566_p0)
}
 0x27e   : > { %2442 = dma.vmem_to_hbm [thread:$0]  (%p2707_p5), %s4286_s9, 16, %s4284_s22, %s4295_s28   ;;  %1910 = vst [vmem:[%s206_s10] sm:$0x1] %v1909_v21 }
 0x27f   : > { %s2570_s29 = scalar_lea.vmem %s4293_s11, 16  ;;  %s2641_s5 = smov [#allocation6]  }
 0x280   : > { %p2571_p1 = scmp.ne.s32.totalorder %s4293_s11, %s2570_s29  ;;  %s2574_s6 = sshll.u32 %s2641_s5, 4  ;;  %s2575_s6 = int_to_ptr.vmem [resolvable:$false] %s2574_s6 }
 0x281   : > { %s2576_s12 = scalar_lea.vmem %s2575_s6, 32  ;;  %p2577_p4 = scmp.lt.s32.totalorder %s4293_s11, %s2575_s6 }
 0x282   : > { %p2572_p2 = pnand %p2571_p1, %p2707_p5  ;;  %p2578_p7 = scmp.lt.s32.totalorder %s2576_s12, %s2570_s29 }
 0x284   : > { %p2573_p3 = pneg %p2572_p2  ;;  %p2579_p8 = por %p2578_p7, %p2577_p4 }
 0x286   : > { %p2580_p9 = pnand %p2579_p8, %p2573_p3 }
 0x288   : > { %2583 = shalt.err (!%p2580_p9)
}
 0x289   : > { %s2584_s13 = scalar_lea.hbm %s4291_s27, 16  ;;  %s2588_s22 = scalar_lea.hbm %s4364_s4, 32 }
 0x28a   : > { %p2585_p10 = scmp.ne.s32.totalorder %s4291_s27, %s2584_s13  ;;  %p2589_p13 = scmp.lt.s32.totalorder %s4291_s27, %s4364_s4 }
 0x28b   : > { %p2590_p0 = scmp.lt.s32.totalorder %s2588_s22, %s2584_s13 }
 0x28c   : > { %p2586_p11 = pnand %p2585_p10, %p2707_p5 }
 0x28d   : > { %p2591_p1 = por %p2590_p0, %p2589_p13 }
 0x28e   : > { %p2587_p12 = pneg %p2586_p11 }
 0x290   : > { %p2592_p2 = pnand %p2591_p1, %p2587_p12 }
 0x292   : > { %2595 = shalt.err (!%p2592_p2)
}
 0x293   : > { %2443 = dma.vmem_to_hbm [thread:$0]  (%p2707_p5), %s4293_s11, 16, %s4291_s27, %s4295_s28  }
 0x294 PF: > { %p2457_p3 = scmp.ge.s32.totalorder %s2634_s18, 2  ;;  %s1974_s8 = sand.u32 1, %s2622_s15  }
 0x295   : > { %s1975_s14 = scalar_lea.sflag [#allocation3], %s1974_s8 }
 0x296   : > { %p2448_p4 = pnand %p2457_p3, %p2711_p6 }
 0x298   : > { %p2449_p7 = pneg %p2448_p4 }
 0x29a   : > { %2613 = dma.done.wait (%p2449_p7), %s1975_s14, 4096  }
 0x29b   : > { %2615 = vsyncadd (%p2449_p7), %s1975_s14, 4294963200  ;;  %s1983_s19 = sand.u32 1, %s2074_s20  }
 0x29c   : > { %s1984_s25 = scalar_lea.sflag [#allocation5], %s1983_s19 }
 0x29d   : > { %2617 = dma.done.wait (%p2449_p7), %s1984_s25, 32  }
 0x29e   : > { %2619 = vsyncadd (%p2449_p7), %s1984_s25, 4294967264  ;;  %p18_p5 = scmp.ge.s32.totalorder %s2692_s21, 4   ;;  %s4490_s15 = smov %s2626_s16 }
 0x29f   : > { %s4491_s16 = smov %s2630_s17  ;;  %s4492_s17 = smov %s2705_s24 }
 0x2a0   : > { %s4493_s18 = smov %s2692_s21  ;;  %20 = sbr.rel (!%p18_p5) target bundleno = 5 (0x5), region = 97 }
 0x2a5   :  { %1996 = vsyncpa [#allocation3], 1 }
 0x2a6   :  { %1998 = vsyncpa [#allocation3 + $0x1], 1 }
 0x2a7   :  { %1999 = vsyncpa [#allocation5], 1 }
 0x2a8   :  { %2001 = vsyncpa [#allocation5 + $0x1], 1 }

</bundles_post_ra>
